<compile_context>
chip_gen: v6e
topology: v6e:2x2x1
jax: 0.10.0
libtpu: 0.0.40
codegen_flags: <defaults>
</compile_context>

<pallas_src>
import functools
import math

import jax
import jax.numpy as jnp
from jax.experimental import pallas as pl
from jax.experimental.pallas import tpu as pltpu


def _gat_forward_kernel(*refs, num_layers, num_heads, d_head,
                        attn_slope, act_slope):
    """Whole UnsupervisedGAT forward on a small graph, everything in VMEM.

    refs = (adj_ref, h_ref, w_aug_ref_0, ..., w_aug_ref_{L-1}, out_ref)
      adj_ref   : [N, N]           adjacency mask, adj[dst, src] in {0, 1}
      h_ref     : [N, D_in0]       input node features
      w_aug_ref : [D_in_l, H*d_head + 2*H]  per layer:
                    columns [0 : H*d)        -> per-head projection W
                    columns [H*d : H*d + H)  -> u_src (gives a_src . z)
                    columns [H*d + H : ]     -> u_dst (gives a_dst . z)
      out_ref   : [N, H*d_head]
    """
    adj_ref, h_ref = refs[0], refs[1]
    w_refs = refs[2:2 + num_layers]
    out_ref = refs[2 + num_layers]

    d_feat = num_heads * d_head
    neg_inf = jnp.float32(-1e30)

    # hoisted: adjacency compare done once for all layers and heads
    mask = adj_ref[...] > 0.0                                   # [N_dst, N_src]

    h = h_ref[...]                                              # [N, D_in0]

    for layer in range(num_layers):                             # static unroll
        w_aug = w_refs[layer][...]                              # [D_in, d_feat+2H]

        # one MXU matmul: all head projections + both attention scores
        proj = jnp.dot(h, w_aug, preferred_element_type=jnp.float32)
        z_all = proj[:, :d_feat]                                # [N, H*d_head]
        s_src = proj[:, d_feat:d_feat + num_heads]              # [N, H]  a_src.z
        s_dst = proj[:, d_feat + num_heads:d_feat + 2 * num_heads]  # [N, H]
        s_src_t = s_src.T                                       # [H, N] (1 XLU transpose/layer)

        head_outs = []
        for hd in range(num_heads):                             # static unroll
            # e[j, i] = leaky_relu_{0.2}(a_src.z_i + a_dst.z_j)
            e = s_dst[:, hd:hd + 1] + s_src_t[hd:hd + 1, :]     # [N_dst, N_src]
            e = jnp.where(e > 0, e, attn_slope * e)
            e = jnp.where(mask, e, neg_inf)

            # masked softmax over incoming edges (src axis)
            m = jnp.max(e, axis=1, keepdims=True)
            p = jnp.where(mask, jnp.exp(e - m), 0.0)
            denom = jnp.sum(p, axis=1, keepdims=True)
            denom = jnp.maximum(denom, jnp.float32(1e-30))      # isolated-node guard
            alpha = p * pl.reciprocal(denom, approx=True)       # EUP, not VALU divide

            # weighted aggregation of neighbor features (MXU)
            z = z_all[:, hd * d_head:(hd + 1) * d_head]         # [N, d_head]
            head_outs.append(
                jnp.dot(alpha, z, preferred_element_type=jnp.float32))

        out = jnp.concatenate(head_outs, axis=1)                # [N, H*d_head]
        if layer + 1 < num_layers:                              # inter-layer leaky_relu(0.01)
            out = jnp.where(out > 0, out, act_slope * out)
        h = out

    out_ref[...] = h                                            # single lane-dense store


def _build_augmented_weights(params):
    """Fold per-head W and attention vectors into one projection matrix per layer.

    params[l] = (w, a) with w: [H, d_head, d_in], a: [H, 2, d_head]
    returns w_aug[l]: [d_in, H*d_head + 2*H]
    """
    w_augs = []
    for (w, a) in params:
        num_heads, d_head, d_in = w.shape
        # columns h*d_head + k of (h @ W_all) == h @ w[h, k, :]
        w_all = jnp.transpose(w, (2, 0, 1)).reshape(d_in, num_heads * d_head)
        # (h @ u_src)[:, h] == sum_k a[h,0,k] * z[:, k] == a_src . z
        u_src = jnp.einsum('hk,hki->ih', a[:, 0, :], w)         # [d_in, H]
        u_dst = jnp.einsum('hk,hki->ih', a[:, 1, :], w)         # [d_in, H]
        w_augs.append(jnp.concatenate([w_all, u_src, u_dst], axis=1))
    return w_augs


def unsupervised_gat_forward(params, adj, n_feat, e_feat=None):
    """Forward pass of UnsupervisedGAT as a single fused Pallas kernel.

    e_feat is accepted for interface parity but unused (GATLayer ignores it).
    """
    num_layers = len(params)
    num_heads, d_head, _ = params[0][0].shape
    n = n_feat.shape[0]
    d_feat = num_heads * d_head

    w_augs = _build_augmented_weights(params)

    kernel = functools.partial(
        _gat_forward_kernel,
        num_layers=num_layers, num_heads=num_heads, d_head=d_head,
        attn_slope=0.2, act_slope=0.01)

    in_specs = [
        pl.BlockSpec(adj.shape, lambda i: (0, 0)),
        pl.BlockSpec(n_feat.shape, lambda i: (0, 0)),
    ] + [pl.BlockSpec(w.shape, lambda i: (0, 0)) for w in w_augs]

    return pl.pallas_call(
        kernel,
        out_shape=jax.ShapeDtypeStruct((n, d_feat), jnp.float32),
        grid=(1,),
        in_specs=in_specs,
        out_specs=pl.BlockSpec((n, d_feat), lambda i: (0, 0)),
    )(adj, n_feat, *w_augs)


def init_unsupervised_gat_params(key, node_input_dim, node_hidden_dim,
                                 num_layers, num_heads):
    """Deterministic xavier_normal init (gain = sqrt(2), like calculate_gain('relu'))."""
    assert node_hidden_dim % num_heads == 0
    d_head = node_hidden_dim // num_heads
    gain = math.sqrt(2.0)
    params = []
    for i in range(num_layers):
        d_in = node_input_dim if i == 0 else node_hidden_dim
        key, k_w, k_a = jax.random.split(key, 3)
        std_w = gain * math.sqrt(2.0 / (d_in + d_head))
        std_a = gain * math.sqrt(2.0 / (2 * d_head + 1))
        w = std_w * jax.random.normal(k_w, (num_heads, d_head, d_in), jnp.float32)
        a = std_a * jax.random.normal(k_a, (num_heads, 2, d_head), jnp.float32)
        params.append((w, a))
    return params


if __name__ == "__main__":
    # small shapes consistent with the module
    N_NODES = 16
    NODE_INPUT_DIM = 16
    NODE_HIDDEN_DIM = 32
    EDGE_INPUT_DIM = 4      # unused by GATLayer
    NUM_LAYERS = 2
    NUM_HEADS = 4

    key = jax.random.PRNGKey(0)
    k_feat, k_adj, k_param, k_edge = jax.random.split(key, 4)

    # node features [N, node_input_dim]
    n_feat = jax.random.normal(k_feat, (N_NODES, NODE_INPUT_DIM), jnp.float32)
    # unused edge features (kept for interface parity)
    e_feat = jax.random.normal(k_edge, (N_NODES * 2, EDGE_INPUT_DIM), jnp.float32)

    # dense adjacency mask adj[dst, src], with self-loops so every node has a neighbor
    rand_adj = (jax.random.uniform(k_adj, (N_NODES, N_NODES)) < 0.3)
    adj = jnp.maximum(rand_adj.astype(jnp.float32), jnp.eye(N_NODES, dtype=jnp.float32))

    params = init_unsupervised_gat_params(
        k_param, NODE_INPUT_DIM, NODE_HIDDEN_DIM, NUM_LAYERS, NUM_HEADS)

    out = unsupervised_gat_forward(params, adj, n_feat, e_feat)
    out = jax.block_until_ready(out)
    assert out.shape == (N_NODES, NODE_HIDDEN_DIM)
    assert bool(jnp.all(jnp.isfinite(out)))
    print("KERNEL_OK")
</pallas_src>

<mosaic_0001>
module attributes {stable_mosaic.version = 11 : i64} {
  func.func @_gat_forward_kernel(%arg0: i32, %arg1: memref<16x16xf32, #tpu.memory_space<vmem>>, %arg2: memref<16x16xf32, #tpu.memory_space<vmem>>, %arg3: memref<16x40xf32, #tpu.memory_space<vmem>>, %arg4: memref<32x40xf32, #tpu.memory_space<vmem>>, %arg5: memref<16x32xf32, #tpu.memory_space<vmem>>) attributes {dimension_semantics = [#tpu.dimension_semantics<arbitrary>], iteration_bounds = array<i64: 1>, scalar_prefetch = 0 : i64, scratch_operands = 0 : i64, tpu.core_type = #tpu.core_type<tc>, window_params = [{pipeline_mode = #tpu.pipeline_mode<synchronous>, transform_indices = @transform_0, window_bounds = array<i64: 16, 16>}, {pipeline_mode = #tpu.pipeline_mode<synchronous>, transform_indices = @transform_1, window_bounds = array<i64: 16, 16>}, {pipeline_mode = #tpu.pipeline_mode<synchronous>, transform_indices = @transform_2, window_bounds = array<i64: 16, 40>}, {pipeline_mode = #tpu.pipeline_mode<synchronous>, transform_indices = @transform_3, window_bounds = array<i64: 32, 40>}, {pipeline_mode = #tpu.pipeline_mode<synchronous>, transform_indices = @transform_4, window_bounds = array<i64: 16, 32>}]} {
    %c0 = arith.constant 0 : index
    %c0_0 = arith.constant 0 : index
    %0 = vector.load %arg1[%c0, %c0_0] : memref<16x16xf32, #tpu.memory_space<vmem>>, vector<16x16xf32>
    %cst = arith.constant 0.000000e+00 : f32
    %1 = vector.broadcast %cst : f32 to vector<16x16xf32>
    %2 = arith.cmpf ogt, %0, %1 : vector<16x16xf32>
    %c0_1 = arith.constant 0 : index
    %c0_2 = arith.constant 0 : index
    %3 = vector.load %arg2[%c0_1, %c0_2] : memref<16x16xf32, #tpu.memory_space<vmem>>, vector<16x16xf32>
    %c0_3 = arith.constant 0 : index
    %c0_4 = arith.constant 0 : index
    %4 = vector.load %arg3[%c0_3, %c0_4] : memref<16x40xf32, #tpu.memory_space<vmem>>, vector<16x40xf32>
    %cst_5 = arith.constant dense<0.000000e+00> : vector<16x40xf32>
    %5 = tpu.matmul %3, %4, %cst_5 {dimension_numbers = #tpu.dot_dimension_numbers<[1], [0], [0], [1], [0, 0, 1, 1], [], []>} : vector<16x16xf32>, vector<16x40xf32>, vector<16x40xf32> -> vector<16x40xf32>
    %6 = vector.extract_strided_slice %5 {offsets = [0, 0], sizes = [16, 32], strides = [1, 1]} : vector<16x40xf32> to vector<16x32xf32>
    %7 = vector.extract_strided_slice %5 {offsets = [0, 32], sizes = [16, 4], strides = [1, 1]} : vector<16x40xf32> to vector<16x4xf32>
    %8 = vector.extract_strided_slice %5 {offsets = [0, 36], sizes = [16, 4], strides = [1, 1]} : vector<16x40xf32> to vector<16x4xf32>
    %9 = tpu.transpose %7, [1, 0] : vector<16x4xf32> -> vector<4x16xf32>
    %10 = vector.extract_strided_slice %8 {offsets = [0, 0], sizes = [16, 1], strides = [1, 1]} : vector<16x4xf32> to vector<16x1xf32>
    %11 = vector.extract_strided_slice %9 {offsets = [0, 0], sizes = [1, 16], strides = [1, 1]} : vector<4x16xf32> to vector<1x16xf32>
    %12 = vector.broadcast %10 : vector<16x1xf32> to vector<16x16xf32>
    %13 = vector.broadcast %11 : vector<1x16xf32> to vector<16x16xf32>
    %14 = arith.addf %12, %13 : vector<16x16xf32>
    %cst_6 = arith.constant 0.000000e+00 : f32
    %15 = vector.broadcast %cst_6 : f32 to vector<16x16xf32>
    %16 = arith.cmpf ogt, %14, %15 : vector<16x16xf32>
    %cst_7 = arith.constant 2.000000e-01 : f32
    %17 = vector.broadcast %cst_7 : f32 to vector<16x16xf32>
    %18 = arith.mulf %17, %14 : vector<16x16xf32>
    %19 = arith.select %16, %14, %18 : vector<16x16xi1>, vector<16x16xf32>
    %cst_8 = arith.constant -1.000000e+30 : f32
    %20 = vector.broadcast %cst_8 : f32 to vector<16x16xf32>
    %21 = arith.select %2, %19, %20 : vector<16x16xi1>, vector<16x16xf32>
    %cst_9 = arith.constant dense<0xFF800000> : vector<16xf32>
    %22 = vector.multi_reduction <maximumf>, %21, %cst_9 [1] : vector<16x16xf32> to vector<16xf32>
    %23 = vector.shape_cast %22 : vector<16xf32> to vector<16x1xf32>
    %24 = vector.broadcast %23 : vector<16x1xf32> to vector<16x16xf32>
    %25 = arith.subf %21, %24 : vector<16x16xf32>
    %26 = math.exp %25 : vector<16x16xf32>
    %cst_10 = arith.constant 0.000000e+00 : f32
    %27 = vector.broadcast %cst_10 : f32 to vector<16x16xf32>
    %28 = arith.select %2, %26, %27 : vector<16x16xi1>, vector<16x16xf32>
    %cst_11 = arith.constant dense<0.000000e+00> : vector<16xf32>
    %29 = vector.multi_reduction <add>, %28, %cst_11 [1] : vector<16x16xf32> to vector<16xf32>
    %30 = vector.shape_cast %29 : vector<16xf32> to vector<16x1xf32>
    %cst_12 = arith.constant 1.000000e-30 : f32
    %31 = vector.broadcast %cst_12 : f32 to vector<16x1xf32>
    %32 = arith.maximumf %30, %31 : vector<16x1xf32>
    %33 = tpu.reciprocal %32 {approx = true} : vector<16x1xf32> -> vector<16x1xf32>
    %34 = vector.broadcast %33 : vector<16x1xf32> to vector<16x16xf32>
    %35 = arith.mulf %28, %34 : vector<16x16xf32>
    %36 = vector.extract_strided_slice %6 {offsets = [0, 0], sizes = [16, 8], strides = [1, 1]} : vector<16x32xf32> to vector<16x8xf32>
    %cst_13 = arith.constant dense<0.000000e+00> : vector<16x8xf32>
    %37 = tpu.matmul %35, %36, %cst_13 {dimension_numbers = #tpu.dot_dimension_numbers<[1], [0], [0], [1], [0, 0, 1, 1], [], []>} : vector<16x16xf32>, vector<16x8xf32>, vector<16x8xf32> -> vector<16x8xf32>
    %38 = vector.extract_strided_slice %8 {offsets = [0, 1], sizes = [16, 1], strides = [1, 1]} : vector<16x4xf32> to vector<16x1xf32>
    %39 = vector.extract_strided_slice %9 {offsets = [1, 0], sizes = [1, 16], strides = [1, 1]} : vector<4x16xf32> to vector<1x16xf32>
    %40 = vector.broadcast %38 : vector<16x1xf32> to vector<16x16xf32>
    %41 = vector.broadcast %39 : vector<1x16xf32> to vector<16x16xf32>
    %42 = arith.addf %40, %41 : vector<16x16xf32>
    %cst_14 = arith.constant 0.000000e+00 : f32
    %43 = vector.broadcast %cst_14 : f32 to vector<16x16xf32>
    %44 = arith.cmpf ogt, %42, %43 : vector<16x16xf32>
    %cst_15 = arith.constant 2.000000e-01 : f32
    %45 = vector.broadcast %cst_15 : f32 to vector<16x16xf32>
    %46 = arith.mulf %45, %42 : vector<16x16xf32>
    %47 = arith.select %44, %42, %46 : vector<16x16xi1>, vector<16x16xf32>
    %cst_16 = arith.constant -1.000000e+30 : f32
    %48 = vector.broadcast %cst_16 : f32 to vector<16x16xf32>
    %49 = arith.select %2, %47, %48 : vector<16x16xi1>, vector<16x16xf32>
    %cst_17 = arith.constant dense<0xFF800000> : vector<16xf32>
    %50 = vector.multi_reduction <maximumf>, %49, %cst_17 [1] : vector<16x16xf32> to vector<16xf32>
    %51 = vector.shape_cast %50 : vector<16xf32> to vector<16x1xf32>
    %52 = vector.broadcast %51 : vector<16x1xf32> to vector<16x16xf32>
    %53 = arith.subf %49, %52 : vector<16x16xf32>
    %54 = math.exp %53 : vector<16x16xf32>
    %cst_18 = arith.constant 0.000000e+00 : f32
    %55 = vector.broadcast %cst_18 : f32 to vector<16x16xf32>
    %56 = arith.select %2, %54, %55 : vector<16x16xi1>, vector<16x16xf32>
    %cst_19 = arith.constant dense<0.000000e+00> : vector<16xf32>
    %57 = vector.multi_reduction <add>, %56, %cst_19 [1] : vector<16x16xf32> to vector<16xf32>
    %58 = vector.shape_cast %57 : vector<16xf32> to vector<16x1xf32>
    %cst_20 = arith.constant 1.000000e-30 : f32
    %59 = vector.broadcast %cst_20 : f32 to vector<16x1xf32>
    %60 = arith.maximumf %58, %59 : vector<16x1xf32>
    %61 = tpu.reciprocal %60 {approx = true} : vector<16x1xf32> -> vector<16x1xf32>
    %62 = vector.broadcast %61 : vector<16x1xf32> to vector<16x16xf32>
    %63 = arith.mulf %56, %62 : vector<16x16xf32>
    %64 = vector.extract_strided_slice %6 {offsets = [0, 8], sizes = [16, 8], strides = [1, 1]} : vector<16x32xf32> to vector<16x8xf32>
    %cst_21 = arith.constant dense<0.000000e+00> : vector<16x8xf32>
    %65 = tpu.matmul %63, %64, %cst_21 {dimension_numbers = #tpu.dot_dimension_numbers<[1], [0], [0], [1], [0, 0, 1, 1], [], []>} : vector<16x16xf32>, vector<16x8xf32>, vector<16x8xf32> -> vector<16x8xf32>
    %66 = vector.extract_strided_slice %8 {offsets = [0, 2], sizes = [16, 1], strides = [1, 1]} : vector<16x4xf32> to vector<16x1xf32>
    %67 = vector.extract_strided_slice %9 {offsets = [2, 0], sizes = [1, 16], strides = [1, 1]} : vector<4x16xf32> to vector<1x16xf32>
    %68 = vector.broadcast %66 : vector<16x1xf32> to vector<16x16xf32>
    %69 = vector.broadcast %67 : vector<1x16xf32> to vector<16x16xf32>
    %70 = arith.addf %68, %69 : vector<16x16xf32>
    %cst_22 = arith.constant 0.000000e+00 : f32
    %71 = vector.broadcast %cst_22 : f32 to vector<16x16xf32>
    %72 = arith.cmpf ogt, %70, %71 : vector<16x16xf32>
    %cst_23 = arith.constant 2.000000e-01 : f32
    %73 = vector.broadcast %cst_23 : f32 to vector<16x16xf32>
    %74 = arith.mulf %73, %70 : vector<16x16xf32>
    %75 = arith.select %72, %70, %74 : vector<16x16xi1>, vector<16x16xf32>
    %cst_24 = arith.constant -1.000000e+30 : f32
    %76 = vector.broadcast %cst_24 : f32 to vector<16x16xf32>
    %77 = arith.select %2, %75, %76 : vector<16x16xi1>, vector<16x16xf32>
    %cst_25 = arith.constant dense<0xFF800000> : vector<16xf32>
    %78 = vector.multi_reduction <maximumf>, %77, %cst_25 [1] : vector<16x16xf32> to vector<16xf32>
    %79 = vector.shape_cast %78 : vector<16xf32> to vector<16x1xf32>
    %80 = vector.broadcast %79 : vector<16x1xf32> to vector<16x16xf32>
    %81 = arith.subf %77, %80 : vector<16x16xf32>
    %82 = math.exp %81 : vector<16x16xf32>
    %cst_26 = arith.constant 0.000000e+00 : f32
    %83 = vector.broadcast %cst_26 : f32 to vector<16x16xf32>
    %84 = arith.select %2, %82, %83 : vector<16x16xi1>, vector<16x16xf32>
    %cst_27 = arith.constant dense<0.000000e+00> : vector<16xf32>
    %85 = vector.multi_reduction <add>, %84, %cst_27 [1] : vector<16x16xf32> to vector<16xf32>
    %86 = vector.shape_cast %85 : vector<16xf32> to vector<16x1xf32>
    %cst_28 = arith.constant 1.000000e-30 : f32
    %87 = vector.broadcast %cst_28 : f32 to vector<16x1xf32>
    %88 = arith.maximumf %86, %87 : vector<16x1xf32>
    %89 = tpu.reciprocal %88 {approx = true} : vector<16x1xf32> -> vector<16x1xf32>
    %90 = vector.broadcast %89 : vector<16x1xf32> to vector<16x16xf32>
    %91 = arith.mulf %84, %90 : vector<16x16xf32>
    %92 = vector.extract_strided_slice %6 {offsets = [0, 16], sizes = [16, 8], strides = [1, 1]} : vector<16x32xf32> to vector<16x8xf32>
    %cst_29 = arith.constant dense<0.000000e+00> : vector<16x8xf32>
    %93 = tpu.matmul %91, %92, %cst_29 {dimension_numbers = #tpu.dot_dimension_numbers<[1], [0], [0], [1], [0, 0, 1, 1], [], []>} : vector<16x16xf32>, vector<16x8xf32>, vector<16x8xf32> -> vector<16x8xf32>
    %94 = vector.extract_strided_slice %8 {offsets = [0, 3], sizes = [16, 1], strides = [1, 1]} : vector<16x4xf32> to vector<16x1xf32>
    %95 = vector.extract_strided_slice %9 {offsets = [3, 0], sizes = [1, 16], strides = [1, 1]} : vector<4x16xf32> to vector<1x16xf32>
    %96 = vector.broadcast %94 : vector<16x1xf32> to vector<16x16xf32>
    %97 = vector.broadcast %95 : vector<1x16xf32> to vector<16x16xf32>
    %98 = arith.addf %96, %97 : vector<16x16xf32>
    %cst_30 = arith.constant 0.000000e+00 : f32
    %99 = vector.broadcast %cst_30 : f32 to vector<16x16xf32>
    %100 = arith.cmpf ogt, %98, %99 : vector<16x16xf32>
    %cst_31 = arith.constant 2.000000e-01 : f32
    %101 = vector.broadcast %cst_31 : f32 to vector<16x16xf32>
    %102 = arith.mulf %101, %98 : vector<16x16xf32>
    %103 = arith.select %100, %98, %102 : vector<16x16xi1>, vector<16x16xf32>
    %cst_32 = arith.constant -1.000000e+30 : f32
    %104 = vector.broadcast %cst_32 : f32 to vector<16x16xf32>
    %105 = arith.select %2, %103, %104 : vector<16x16xi1>, vector<16x16xf32>
    %cst_33 = arith.constant dense<0xFF800000> : vector<16xf32>
    %106 = vector.multi_reduction <maximumf>, %105, %cst_33 [1] : vector<16x16xf32> to vector<16xf32>
    %107 = vector.shape_cast %106 : vector<16xf32> to vector<16x1xf32>
    %108 = vector.broadcast %107 : vector<16x1xf32> to vector<16x16xf32>
    %109 = arith.subf %105, %108 : vector<16x16xf32>
    %110 = math.exp %109 : vector<16x16xf32>
    %cst_34 = arith.constant 0.000000e+00 : f32
    %111 = vector.broadcast %cst_34 : f32 to vector<16x16xf32>
    %112 = arith.select %2, %110, %111 : vector<16x16xi1>, vector<16x16xf32>
    %cst_35 = arith.constant dense<0.000000e+00> : vector<16xf32>
    %113 = vector.multi_reduction <add>, %112, %cst_35 [1] : vector<16x16xf32> to vector<16xf32>
    %114 = vector.shape_cast %113 : vector<16xf32> to vector<16x1xf32>
    %cst_36 = arith.constant 1.000000e-30 : f32
    %115 = vector.broadcast %cst_36 : f32 to vector<16x1xf32>
    %116 = arith.maximumf %114, %115 : vector<16x1xf32>
    %117 = tpu.reciprocal %116 {approx = true} : vector<16x1xf32> -> vector<16x1xf32>
    %118 = vector.broadcast %117 : vector<16x1xf32> to vector<16x16xf32>
    %119 = arith.mulf %112, %118 : vector<16x16xf32>
    %120 = vector.extract_strided_slice %6 {offsets = [0, 24], sizes = [16, 8], strides = [1, 1]} : vector<16x32xf32> to vector<16x8xf32>
    %cst_37 = arith.constant dense<0.000000e+00> : vector<16x8xf32>
    %121 = tpu.matmul %119, %120, %cst_37 {dimension_numbers = #tpu.dot_dimension_numbers<[1], [0], [0], [1], [0, 0, 1, 1], [], []>} : vector<16x16xf32>, vector<16x8xf32>, vector<16x8xf32> -> vector<16x8xf32>
    %122 = tpu.concatenate %37, %65, %93, %121 in 1 : vector<16x8xf32>, vector<16x8xf32>, vector<16x8xf32>, vector<16x8xf32> -> vector<16x32xf32>
    %cst_38 = arith.constant 0.000000e+00 : f32
    %123 = vector.broadcast %cst_38 : f32 to vector<16x32xf32>
    %124 = arith.cmpf ogt, %122, %123 : vector<16x32xf32>
    %cst_39 = arith.constant 0.00999999977 : f32
    %125 = vector.broadcast %cst_39 : f32 to vector<16x32xf32>
    %126 = arith.mulf %125, %122 : vector<16x32xf32>
    %127 = arith.select %124, %122, %126 : vector<16x32xi1>, vector<16x32xf32>
    %c0_40 = arith.constant 0 : index
    %c0_41 = arith.constant 0 : index
    %128 = vector.load %arg4[%c0_40, %c0_41] : memref<32x40xf32, #tpu.memory_space<vmem>>, vector<32x40xf32>
    %cst_42 = arith.constant dense<0.000000e+00> : vector<16x40xf32>
    %129 = tpu.matmul %127, %128, %cst_42 {dimension_numbers = #tpu.dot_dimension_numbers<[1], [0], [0], [1], [0, 0, 1, 1], [], []>} : vector<16x32xf32>, vector<32x40xf32>, vector<16x40xf32> -> vector<16x40xf32>
    %130 = vector.extract_strided_slice %129 {offsets = [0, 0], sizes = [16, 32], strides = [1, 1]} : vector<16x40xf32> to vector<16x32xf32>
    %131 = vector.extract_strided_slice %129 {offsets = [0, 32], sizes = [16, 4], strides = [1, 1]} : vector<16x40xf32> to vector<16x4xf32>
    %132 = vector.extract_strided_slice %129 {offsets = [0, 36], sizes = [16, 4], strides = [1, 1]} : vector<16x40xf32> to vector<16x4xf32>
    %133 = tpu.transpose %131, [1, 0] : vector<16x4xf32> -> vector<4x16xf32>
    %134 = vector.extract_strided_slice %132 {offsets = [0, 0], sizes = [16, 1], strides = [1, 1]} : vector<16x4xf32> to vector<16x1xf32>
    %135 = vector.extract_strided_slice %133 {offsets = [0, 0], sizes = [1, 16], strides = [1, 1]} : vector<4x16xf32> to vector<1x16xf32>
    %136 = vector.broadcast %134 : vector<16x1xf32> to vector<16x16xf32>
    %137 = vector.broadcast %135 : vector<1x16xf32> to vector<16x16xf32>
    %138 = arith.addf %136, %137 : vector<16x16xf32>
    %cst_43 = arith.constant 0.000000e+00 : f32
    %139 = vector.broadcast %cst_43 : f32 to vector<16x16xf32>
    %140 = arith.cmpf ogt, %138, %139 : vector<16x16xf32>
    %cst_44 = arith.constant 2.000000e-01 : f32
    %141 = vector.broadcast %cst_44 : f32 to vector<16x16xf32>
    %142 = arith.mulf %141, %138 : vector<16x16xf32>
    %143 = arith.select %140, %138, %142 : vector<16x16xi1>, vector<16x16xf32>
    %cst_45 = arith.constant -1.000000e+30 : f32
    %144 = vector.broadcast %cst_45 : f32 to vector<16x16xf32>
    %145 = arith.select %2, %143, %144 : vector<16x16xi1>, vector<16x16xf32>
    %cst_46 = arith.constant dense<0xFF800000> : vector<16xf32>
    %146 = vector.multi_reduction <maximumf>, %145, %cst_46 [1] : vector<16x16xf32> to vector<16xf32>
    %147 = vector.shape_cast %146 : vector<16xf32> to vector<16x1xf32>
    %148 = vector.broadcast %147 : vector<16x1xf32> to vector<16x16xf32>
    %149 = arith.subf %145, %148 : vector<16x16xf32>
    %150 = math.exp %149 : vector<16x16xf32>
    %cst_47 = arith.constant 0.000000e+00 : f32
    %151 = vector.broadcast %cst_47 : f32 to vector<16x16xf32>
    %152 = arith.select %2, %150, %151 : vector<16x16xi1>, vector<16x16xf32>
    %cst_48 = arith.constant dense<0.000000e+00> : vector<16xf32>
    %153 = vector.multi_reduction <add>, %152, %cst_48 [1] : vector<16x16xf32> to vector<16xf32>
    %154 = vector.shape_cast %153 : vector<16xf32> to vector<16x1xf32>
    %cst_49 = arith.constant 1.000000e-30 : f32
    %155 = vector.broadcast %cst_49 : f32 to vector<16x1xf32>
    %156 = arith.maximumf %154, %155 : vector<16x1xf32>
    %157 = tpu.reciprocal %156 {approx = true} : vector<16x1xf32> -> vector<16x1xf32>
    %158 = vector.broadcast %157 : vector<16x1xf32> to vector<16x16xf32>
    %159 = arith.mulf %152, %158 : vector<16x16xf32>
    %160 = vector.extract_strided_slice %130 {offsets = [0, 0], sizes = [16, 8], strides = [1, 1]} : vector<16x32xf32> to vector<16x8xf32>
    %cst_50 = arith.constant dense<0.000000e+00> : vector<16x8xf32>
    %161 = tpu.matmul %159, %160, %cst_50 {dimension_numbers = #tpu.dot_dimension_numbers<[1], [0], [0], [1], [0, 0, 1, 1], [], []>} : vector<16x16xf32>, vector<16x8xf32>, vector<16x8xf32> -> vector<16x8xf32>
    %162 = vector.extract_strided_slice %132 {offsets = [0, 1], sizes = [16, 1], strides = [1, 1]} : vector<16x4xf32> to vector<16x1xf32>
    %163 = vector.extract_strided_slice %133 {offsets = [1, 0], sizes = [1, 16], strides = [1, 1]} : vector<4x16xf32> to vector<1x16xf32>
    %164 = vector.broadcast %162 : vector<16x1xf32> to vector<16x16xf32>
    %165 = vector.broadcast %163 : vector<1x16xf32> to vector<16x16xf32>
    %166 = arith.addf %164, %165 : vector<16x16xf32>
    %cst_51 = arith.constant 0.000000e+00 : f32
    %167 = vector.broadcast %cst_51 : f32 to vector<16x16xf32>
    %168 = arith.cmpf ogt, %166, %167 : vector<16x16xf32>
    %cst_52 = arith.constant 2.000000e-01 : f32
    %169 = vector.broadcast %cst_52 : f32 to vector<16x16xf32>
    %170 = arith.mulf %169, %166 : vector<16x16xf32>
    %171 = arith.select %168, %166, %170 : vector<16x16xi1>, vector<16x16xf32>
    %cst_53 = arith.constant -1.000000e+30 : f32
    %172 = vector.broadcast %cst_53 : f32 to vector<16x16xf32>
    %173 = arith.select %2, %171, %172 : vector<16x16xi1>, vector<16x16xf32>
    %cst_54 = arith.constant dense<0xFF800000> : vector<16xf32>
    %174 = vector.multi_reduction <maximumf>, %173, %cst_54 [1] : vector<16x16xf32> to vector<16xf32>
    %175 = vector.shape_cast %174 : vector<16xf32> to vector<16x1xf32>
    %176 = vector.broadcast %175 : vector<16x1xf32> to vector<16x16xf32>
    %177 = arith.subf %173, %176 : vector<16x16xf32>
    %178 = math.exp %177 : vector<16x16xf32>
    %cst_55 = arith.constant 0.000000e+00 : f32
    %179 = vector.broadcast %cst_55 : f32 to vector<16x16xf32>
    %180 = arith.select %2, %178, %179 : vector<16x16xi1>, vector<16x16xf32>
    %cst_56 = arith.constant dense<0.000000e+00> : vector<16xf32>
    %181 = vector.multi_reduction <add>, %180, %cst_56 [1] : vector<16x16xf32> to vector<16xf32>
    %182 = vector.shape_cast %181 : vector<16xf32> to vector<16x1xf32>
    %cst_57 = arith.constant 1.000000e-30 : f32
    %183 = vector.broadcast %cst_57 : f32 to vector<16x1xf32>
    %184 = arith.maximumf %182, %183 : vector<16x1xf32>
    %185 = tpu.reciprocal %184 {approx = true} : vector<16x1xf32> -> vector<16x1xf32>
    %186 = vector.broadcast %185 : vector<16x1xf32> to vector<16x16xf32>
    %187 = arith.mulf %180, %186 : vector<16x16xf32>
    %188 = vector.extract_strided_slice %130 {offsets = [0, 8], sizes = [16, 8], strides = [1, 1]} : vector<16x32xf32> to vector<16x8xf32>
    %cst_58 = arith.constant dense<0.000000e+00> : vector<16x8xf32>
    %189 = tpu.matmul %187, %188, %cst_58 {dimension_numbers = #tpu.dot_dimension_numbers<[1], [0], [0], [1], [0, 0, 1, 1], [], []>} : vector<16x16xf32>, vector<16x8xf32>, vector<16x8xf32> -> vector<16x8xf32>
    %190 = vector.extract_strided_slice %132 {offsets = [0, 2], sizes = [16, 1], strides = [1, 1]} : vector<16x4xf32> to vector<16x1xf32>
    %191 = vector.extract_strided_slice %133 {offsets = [2, 0], sizes = [1, 16], strides = [1, 1]} : vector<4x16xf32> to vector<1x16xf32>
    %192 = vector.broadcast %190 : vector<16x1xf32> to vector<16x16xf32>
    %193 = vector.broadcast %191 : vector<1x16xf32> to vector<16x16xf32>
    %194 = arith.addf %192, %193 : vector<16x16xf32>
    %cst_59 = arith.constant 0.000000e+00 : f32
    %195 = vector.broadcast %cst_59 : f32 to vector<16x16xf32>
    %196 = arith.cmpf ogt, %194, %195 : vector<16x16xf32>
    %cst_60 = arith.constant 2.000000e-01 : f32
    %197 = vector.broadcast %cst_60 : f32 to vector<16x16xf32>
    %198 = arith.mulf %197, %194 : vector<16x16xf32>
    %199 = arith.select %196, %194, %198 : vector<16x16xi1>, vector<16x16xf32>
    %cst_61 = arith.constant -1.000000e+30 : f32
    %200 = vector.broadcast %cst_61 : f32 to vector<16x16xf32>
    %201 = arith.select %2, %199, %200 : vector<16x16xi1>, vector<16x16xf32>
    %cst_62 = arith.constant dense<0xFF800000> : vector<16xf32>
    %202 = vector.multi_reduction <maximumf>, %201, %cst_62 [1] : vector<16x16xf32> to vector<16xf32>
    %203 = vector.shape_cast %202 : vector<16xf32> to vector<16x1xf32>
    %204 = vector.broadcast %203 : vector<16x1xf32> to vector<16x16xf32>
    %205 = arith.subf %201, %204 : vector<16x16xf32>
    %206 = math.exp %205 : vector<16x16xf32>
    %cst_63 = arith.constant 0.000000e+00 : f32
    %207 = vector.broadcast %cst_63 : f32 to vector<16x16xf32>
    %208 = arith.select %2, %206, %207 : vector<16x16xi1>, vector<16x16xf32>
    %cst_64 = arith.constant dense<0.000000e+00> : vector<16xf32>
    %209 = vector.multi_reduction <add>, %208, %cst_64 [1] : vector<16x16xf32> to vector<16xf32>
    %210 = vector.shape_cast %209 : vector<16xf32> to vector<16x1xf32>
    %cst_65 = arith.constant 1.000000e-30 : f32
    %211 = vector.broadcast %cst_65 : f32 to vector<16x1xf32>
    %212 = arith.maximumf %210, %211 : vector<16x1xf32>
    %213 = tpu.reciprocal %212 {approx = true} : vector<16x1xf32> -> vector<16x1xf32>
    %214 = vector.broadcast %213 : vector<16x1xf32> to vector<16x16xf32>
    %215 = arith.mulf %208, %214 : vector<16x16xf32>
    %216 = vector.extract_strided_slice %130 {offsets = [0, 16], sizes = [16, 8], strides = [1, 1]} : vector<16x32xf32> to vector<16x8xf32>
    %cst_66 = arith.constant dense<0.000000e+00> : vector<16x8xf32>
    %217 = tpu.matmul %215, %216, %cst_66 {dimension_numbers = #tpu.dot_dimension_numbers<[1], [0], [0], [1], [0, 0, 1, 1], [], []>} : vector<16x16xf32>, vector<16x8xf32>, vector<16x8xf32> -> vector<16x8xf32>
    %218 = vector.extract_strided_slice %132 {offsets = [0, 3], sizes = [16, 1], strides = [1, 1]} : vector<16x4xf32> to vector<16x1xf32>
    %219 = vector.extract_strided_slice %133 {offsets = [3, 0], sizes = [1, 16], strides = [1, 1]} : vector<4x16xf32> to vector<1x16xf32>
    %220 = vector.broadcast %218 : vector<16x1xf32> to vector<16x16xf32>
    %221 = vector.broadcast %219 : vector<1x16xf32> to vector<16x16xf32>
    %222 = arith.addf %220, %221 : vector<16x16xf32>
    %cst_67 = arith.constant 0.000000e+00 : f32
    %223 = vector.broadcast %cst_67 : f32 to vector<16x16xf32>
    %224 = arith.cmpf ogt, %222, %223 : vector<16x16xf32>
    %cst_68 = arith.constant 2.000000e-01 : f32
    %225 = vector.broadcast %cst_68 : f32 to vector<16x16xf32>
    %226 = arith.mulf %225, %222 : vector<16x16xf32>
    %227 = arith.select %224, %222, %226 : vector<16x16xi1>, vector<16x16xf32>
    %cst_69 = arith.constant -1.000000e+30 : f32
    %228 = vector.broadcast %cst_69 : f32 to vector<16x16xf32>
    %229 = arith.select %2, %227, %228 : vector<16x16xi1>, vector<16x16xf32>
    %cst_70 = arith.constant dense<0xFF800000> : vector<16xf32>
    %230 = vector.multi_reduction <maximumf>, %229, %cst_70 [1] : vector<16x16xf32> to vector<16xf32>
    %231 = vector.shape_cast %230 : vector<16xf32> to vector<16x1xf32>
    %232 = vector.broadcast %231 : vector<16x1xf32> to vector<16x16xf32>
    %233 = arith.subf %229, %232 : vector<16x16xf32>
    %234 = math.exp %233 : vector<16x16xf32>
    %cst_71 = arith.constant 0.000000e+00 : f32
    %235 = vector.broadcast %cst_71 : f32 to vector<16x16xf32>
    %236 = arith.select %2, %234, %235 : vector<16x16xi1>, vector<16x16xf32>
    %cst_72 = arith.constant dense<0.000000e+00> : vector<16xf32>
    %237 = vector.multi_reduction <add>, %236, %cst_72 [1] : vector<16x16xf32> to vector<16xf32>
    %238 = vector.shape_cast %237 : vector<16xf32> to vector<16x1xf32>
    %cst_73 = arith.constant 1.000000e-30 : f32
    %239 = vector.broadcast %cst_73 : f32 to vector<16x1xf32>
    %240 = arith.maximumf %238, %239 : vector<16x1xf32>
    %241 = tpu.reciprocal %240 {approx = true} : vector<16x1xf32> -> vector<16x1xf32>
    %242 = vector.broadcast %241 : vector<16x1xf32> to vector<16x16xf32>
    %243 = arith.mulf %236, %242 : vector<16x16xf32>
    %244 = vector.extract_strided_slice %130 {offsets = [0, 24], sizes = [16, 8], strides = [1, 1]} : vector<16x32xf32> to vector<16x8xf32>
    %cst_74 = arith.constant dense<0.000000e+00> : vector<16x8xf32>
    %245 = tpu.matmul %243, %244, %cst_74 {dimension_numbers = #tpu.dot_dimension_numbers<[1], [0], [0], [1], [0, 0, 1, 1], [], []>} : vector<16x16xf32>, vector<16x8xf32>, vector<16x8xf32> -> vector<16x8xf32>
    %246 = tpu.concatenate %161, %189, %217, %245 in 1 : vector<16x8xf32>, vector<16x8xf32>, vector<16x8xf32>, vector<16x8xf32> -> vector<16x32xf32>
    %c0_75 = arith.constant 0 : index
    %c0_76 = arith.constant 0 : index
    %247 = vector.load %arg5[%c0_75, %c0_76] : memref<16x32xf32, #tpu.memory_space<vmem>>, vector<16x32xf32>
    tpu.vector_store %arg5[%c0_75, %c0_76], %246 {strides = array<i32>} : memref<16x32xf32, #tpu.memory_space<vmem>>, vector<16x32xf32>,
    return
  }
  func.func @transform_0(%arg0: i32) -> (i32, i32) {
    %c0_i32 = arith.constant 0 : i32
    %c0_i32_0 = arith.constant 0 : i32
    %c0_i32_1 = arith.constant 0 : i32
    return %c0_i32, %c0_i32_0 : i32, i32
  }
  func.func @transform_1(%arg0: i32) -> (i32, i32) {
    %c0_i32 = arith.constant 0 : i32
    %c0_i32_0 = arith.constant 0 : i32
    %c0_i32_1 = arith.constant 0 : i32
    return %c0_i32, %c0_i32_0 : i32, i32
  }
  func.func @transform_2(%arg0: i32) -> (i32, i32) {
    %c0_i32 = arith.constant 0 : i32
    %c0_i32_0 = arith.constant 0 : i32
    %c0_i32_1 = arith.constant 0 : i32
    return %c0_i32, %c0_i32_0 : i32, i32
  }
  func.func @transform_3(%arg0: i32) -> (i32, i32) {
    %c0_i32 = arith.constant 0 : i32
    %c0_i32_0 = arith.constant 0 : i32
    %c0_i32_1 = arith.constant 0 : i32
    return %c0_i32, %c0_i32_0 : i32, i32
  }
  func.func @transform_4(%arg0: i32) -> (i32, i32) {
    %c0_i32 = arith.constant 0 : i32
    %c0_i32_0 = arith.constant 0 : i32
    %c0_i32_1 = arith.constant 0 : i32
    return %c0_i32, %c0_i32_0 : i32, i32
  }
}

</mosaic_0001>

<bundles_post_ra>
// kernel: tpu_custom_call.1
= control target key start
LH: loop header
LB: loop body
LE: loop exit
PB: predicated region body
PF: predicated region fallthrough
CT: control target
= control target key end

     0   :  { %9 = vsyncpa [#allocation3], 0  ;;  %s2190_s0 = inlined_call_operand.hbm [shape: f32[16,16], index: 0, kind: input, shape index: {}]   ;;  %s2191_s1 = inlined_call_operand.hbm [shape: f32[16,16], index: 1, kind: input, shape index: {}]   ;;  %s2192_s2 = inlined_call_operand.hbm [shape: f32[16,40], index: 2, kind: input, shape index: {}]   ;;  %s2193_s3 = inlined_call_operand.hbm [shape: f32[32,40], index: 3, kind: input, shape index: {}]   ;;  %s2194_s4 = inlined_call_operand.hbm [shape: f32[16,32], index: 4, kind: output, shape index: {}]  }
   0x1   :  { %10 = vsyncpa [#allocation6], 0 }
   0x2   :  { %11 = vsyncpa [#allocation9], 0 }
   0x3   :  { %12 = vsyncpa [#allocation4], 0  ;;  %s1826_s15 = smov [#allocation5]   ;;  %s1827_s17 = smov [#allocation2]  }
   0x4   :  { %s30_s16 = sshll.u32 %s1826_s15, 4  ;;  %s18_s18 = sshll.u32 %s1827_s17, 4  ;;  %s31_s16 = int_to_ptr.vmem [resolvable:$true] %s30_s16  ;;  %s19_s18 = int_to_ptr.vmem [resolvable:$true] %s18_s18 }
   0x5   :  { %s1726_s19 = scalar_lea.vmem %s31_s16, 256  ;;  %p1731_p1 = scmp.lt.s32.totalorder %s31_s16, %s31_s16 }
   0x6   :  { %p1727_p0 = scmp.ne.s32.totalorder %s31_s16, %s1726_s19  ;;  %p1732_p2 = scmp.lt.s32.totalorder %s1726_s19, %s1726_s19 }
   0x8   :  { %p1733_p3 = por %p1732_p2, %p1731_p1 }
   0xa   :  { %p1734_p4 = pnand %p1733_p3, %p1727_p0 }
   0xc   :  { %1737 = shalt.err (!%p1734_p4)
}
   0xd   :  { %s1828_s20 = smov 128   ;;  %s1829_s21 = smov 8  }
   0xe   :  { %36 = dma.hbm_to_vmem [thread:$0]  %s2191_s1, 256, %s31_s16, [#allocation6], %s1828_s20, %s1828_s20, %s1829_s21  }
   0xf   :  { %s1746_s24 = scalar_lea.vmem %s19_s18, 256  ;;  %p1751_p6 = scmp.lt.s32.totalorder %s19_s18, %s19_s18 }
  0x10   :  { %p1747_p5 = scmp.ne.s32.totalorder %s19_s18, %s1746_s24  ;;  %p1752_p7 = scmp.lt.s32.totalorder %s1746_s24, %s1746_s24 }
  0x12   :  { %p1753_p8 = por %p1752_p7, %p1751_p6 }
  0x14   :  { %p1754_p9 = pnand %p1753_p8, %p1747_p5 }
  0x16   :  { %1757 = shalt.err (!%p1754_p9)
}
  0x17   :  { %24 = dma.hbm_to_vmem [thread:$0]  %s2190_s0, 256, %s19_s18, [#allocation3], %s1828_s20, %s1828_s20, %s1829_s21  }
  0x18   :  { %s1830_s27 = smov [#allocation7]   ;;  %s1831_s29 = smov [#allocation8]  }
  0x19   :  { %s42_s28 = sshll.u32 %s1830_s27, 4  ;;  %s54_s30 = sshll.u32 %s1831_s29, 4  ;;  %s43_s28 = int_to_ptr.vmem [resolvable:$true] %s42_s28  ;;  %s55_s30 = int_to_ptr.vmem [resolvable:$true] %s54_s30 }
  0x1a   :  { %s1766_s1 = scalar_lea.vmem %s43_s28, 256  ;;  %p1771_p11 = scmp.lt.s32.totalorder %s43_s28, %s43_s28 }
  0x1b   :  { %p1767_p10 = scmp.ne.s32.totalorder %s43_s28, %s1766_s1  ;;  %p1772_p12 = scmp.lt.s32.totalorder %s1766_s1, %s1766_s1 }
  0x1d   :  { %p1773_p13 = por %p1772_p12, %p1771_p11 }
  0x1f   :  { %p1774_p0 = pnand %p1773_p13, %p1767_p10 }
  0x21   :  { %1777 = shalt.err (!%p1774_p0)
}
  0x22   :  { %48 = dma.hbm_to_vmem [thread:$0]  %s2192_s2, 256, %s43_s28, [#allocation6], %s1828_s20, %s1828_s20, %s1829_s21  }
  0x23   :  { %s1786_s0 = scalar_lea.vmem %s55_s30, 512  ;;  %p1791_p2 = scmp.lt.s32.totalorder %s55_s30, %s55_s30 }
  0x24   :  { %p1787_p1 = scmp.ne.s32.totalorder %s55_s30, %s1786_s0  ;;  %p1792_p3 = scmp.lt.s32.totalorder %s1786_s0, %s1786_s0 }
  0x26   :  { %p1793_p4 = por %p1792_p3, %p1791_p2 }
  0x28   :  { %p1794_p5 = pnand %p1793_p4, %p1787_p1 }
  0x2a   :  { %1797 = shalt.err (!%p1794_p5)
}
  0x2b   :  { %60 = dma.hbm_to_vmem [thread:$0]  %s2193_s3, 512, %s55_s30, [#allocation9], %s1828_s20, %s1828_s20, %s1829_s21  }
  0x2c   :  { %1818 = dma.done.wait [#allocation3], 256  }
  0x2d   :  { %1819 = vsyncadd [#allocation3], 4294967040 }
  0x2e   :  { %1820 = dma.done.wait [#allocation6], 512  }
  0x2f   :  { %1821 = vsyncadd [#allocation6], 4294966784 }
  0x30   :  { %1822 = dma.done.wait [#allocation9], 512  }
  0x31   :  { %1823 = vsyncadd [#allocation9], 4294966784  ;;  %v1832_v0 = vmov 36   ;;  %vm81_vm0 = vcmask 130048   ;;  %v80_v1 = vld [vmem:[#allocation7 + $0x8] sm:$0xff]  ;;  %v79_v2 = vld [vmem:[#allocation7] sm:$0xff]  ;;  %v211_v13 = vlaneseq }
  0x32   :  { %1640 = vset.pattern.permute.xlu1 %v1832_v0  ;;  %v77_v3 = vld [vmem:[#allocation5] sm:$0xff]  ;;  %1548 = vmatprep.subr.mxu0 %v80_v1  ;;  %v78_v4 = vld [vmem:[#allocation5 + $0x8] sm:$0xff]  ;;  %v1833_v5 = vmov 38   ;;  %s1834_s2 = smov 96   ;;  %v1835_v8 = vmov 37   ;;  %v1836_v9 = vmov 39  }
  0x33   :  { %1552 = vmatprep.mubr.msk.f32.mxu0 %vm81_vm0, %v77_v3  ;;  %1549 = vmatpush3.msra.mxu0 %v80_v1  ;;  %v1922_v15 = vshrl.u32 %v211_v13, 7  ;;  %v1931_v25 = vld [vmem:[#allocation2 + $0x8] sm:$0xff]  ;;  %v1933_v26 = vld [vmem:[#allocation2] sm:$0xff]  ;;  %s1837_s3 = smov 120   ;;  %s1838_s9 = smov 112   ;;  %vm761_vm11 = vcmask 64512  }
  0x34   :  { %1550 = vmatprep.subr.mxu0 %v79_v2  ;;  %1642 = vset.pattern.permute.xlu0 %v1833_v5  ;;  %vm76_vm1 = vcmp.gt.f32.partialorder %v1931_v25, 0.0  ;;  %vm75_vm2 = vcmp.gt.f32.partialorder %v1933_v26, 0.0  ;;  %s1839_s10 = smov 104   ;;  %s1840_s11 = smov 16   ;;  %vm766_vm12 = vcmask 195584   ;;  %vm779_vm15 = vcmask 261120  }
  0x35   :  { %1551 = vmatpush3.msra.mxu0 %v79_v2  ;;  %v213_v18 = vsub.s32 0, %v1922_v15  ;;  %v342_v19 = vsub.s32 1, %v1922_v15  ;;  %v477_v20 = vsub.s32 2, %v1922_v15  ;;  %v612_v35 = vsub.s32 3, %v1922_v15  ;;  %s1841_s12 = smov 24   ;;  %s1842_s13 = smov [#allocation10]  }
  0x36   :  { %1553 = vmatmul.mubr.msk.f32.vlgmr.msra.gmra.mxu0 %vm81_vm0, %v78_v4  ;;  %s1472_s14 = sshll.u32 %s1842_s13, 4  ;;  %s1473_s14 = int_to_ptr.vmem [resolvable:$true] %s1472_s14 }
  0x37   :  { %s1798_s15 = scalar_lea.vmem %s1473_s14, 256  ;;  %p1803_p7 = scmp.lt.s32.totalorder %s1473_s14, %s1473_s14 }
  0x38   :  { %p1799_p6 = scmp.ne.s32.totalorder %s1473_s14, %s1798_s15  ;;  %p1804_p8 = scmp.lt.s32.totalorder %s1798_s15, %s1798_s15 }
  0x3a   :  { %p1805_p9 = por %p1804_p8, %p1803_p7 }
  0x3c   :  { %p1806_p10 = pnand %p1805_p9, %p1799_p6 }
  0xf6   :  { %v1896_v6 = vpop.f32.mrf.mxu0 }
  0xf7   :  { %208 = vperm.xlu1 %1640, %v1896_v6   ;;  %1555 = vmatprep.subr.mxu1 %v1896_v6 }
  0xf8   :  { %v1900_v7 = vpop.f32.mrf.mxu0  ;;  %1556 = vmatpush3.msra.mxu1 %v1896_v6 }
  0xf9   :  { %165 = vrot.lane.b32.xlu0 %v1900_v7, %s1834_s2  ;;  %1557 = vmatprep.subr.mxu1 %v1900_v7 }
  0xfa   :  { %1558 = vmatpush3.msra.mxu1 %v1900_v7 }
  0xfb   :  { %1641 = vset.pattern.permute.xlu1 %v1835_v8 }
  0xfc   :  { %337 = vperm.xlu1 %1641, %v1896_v6  }
  0xfd   :  { %167 = vrot.lane.b32.xlu0 %v1896_v6, %s1834_s2 }
 0x100   :  { %1643 = vset.pattern.permute.xlu1 %v1832_v0 }
 0x101   :  { %204 = vperm.xlu1 %1643, %v1900_v7   ;;  %472 = vperm.xlu0 %1642, %v1896_v6  }
 0x105   :  { %1645 = vset.pattern.permute.xlu1 %v1833_v5  ;;  %1644 = vset.pattern.permute.xlu0 %v1835_v8 }
 0x106   :  { %468 = vperm.xlu1 %1645, %v1900_v7   ;;  %333 = vperm.xlu0 %1644, %v1900_v7  }
 0x10a   :  { %1646 = vset.pattern.permute.xlu1 %v1836_v9 }
 0x10b   :  { %603 = vperm.xlu1 %1646, %v1900_v7  }
 0x10f   :  { %607 = vperm.xlu1 %1646, %v1896_v6  }
 0x113   :  { %1647 = vset.pattern.permute.xlu1 %v1832_v0 }
 0x16b   :  { %v166_v10 = vpop.permute.xlu0 %165 }
 0x16c   :  { %171 = vxpose.xlu0.b32.start [1/2] (short) (narrow) %v166_v10, 8 }
 0x16f   :  { %v168_v11 = vpop.permute.xlu0 %167 }
 0x170   :  { %172 = vxpose.xlu0.b32.end [2/2] (short) (narrow) %v168_v11, 8 }
 0x172   :  { %v209_v12 = vpop.permute.xlu1 %208 }
 0x177   :  { %v338_v16 = vpop.permute.xlu1 %337 }
 0x17c   :  { %v473_v14 = vpop.permute.xlu0 %472  ;;  %v205_v21 = vpop.permute.xlu1 %204 }
 0x181   :  { %v334_v17 = vpop.permute.xlu0 %333  ;;  %v469_v34 = vpop.permute.xlu1 %468 }
 0x186   :  { %v604_v51 = vpop.permute.xlu1 %603 }
 0x18a   :  { %v608_v58 = vpop.permute.xlu1 %607 }
 0x1e8   :  { %v187_v22 = vpop.trf.xlu0 }
 0x1e9   :  { %v214_v23 = vrot.slane %v187_v22, %v213_v18  ;;  %v343_v24 = vrot.slane %v187_v22, %v342_v19  ;;  %v478_v27 = vrot.slane %v187_v22, %v477_v20  ;;  %v613_v47 = vrot.slane %v187_v22, %v612_v35 }
 0x1eb   :  { %v216_v28 = vadd.f32 %v214_v23, %v209_v12  ;;  %v215_v29 = vadd.f32 %v214_v23, %v205_v21  ;;  %v344_v30 = vadd.f32 %v343_v24, %v334_v17  ;;  %v345_v31 = vadd.f32 %v343_v24, %v338_v16 }
 0x1ec   :  { %v479_v40 = vadd.f32 %v478_v27, %v469_v34  ;;  %v480_v50 = vadd.f32 %v478_v27, %v473_v14  ;;  %v614_v56 = vadd.f32 %v613_v47, %v604_v51  ;;  %v615_v62 = vadd.f32 %v613_v47, %v608_v58 }
 0x1ed   :  { %vm218_vm3 = vcmp.gt.f32.partialorder %v216_v28, 0.0  ;;  %v220_v32 = vmul.f32 0.2, %v216_v28  ;;  %vm217_vm4 = vcmp.gt.f32.partialorder %v215_v29, 0.0  ;;  %v219_v33 = vmul.f32 0.2, %v215_v29 }
 0x1ee   :  { %vm346_vm5 = vcmp.gt.f32.partialorder %v344_v30, 0.0  ;;  %v348_v36 = vmul.f32 0.2, %v344_v30  ;;  %v349_v39 = vmul.f32 0.2, %v345_v31  ;;  %vm347_vm6 = vcmp.gt.f32.partialorder %v345_v31, 0.0 }
 0x1ef   :  { %v222_v37 = vsel %vm218_vm3, %v216_v28, %v220_v32  ;;  %v221_v38 = vsel %vm217_vm4, %v215_v29, %v219_v33  ;;  %v483_v49 = vmul.f32 0.2, %v479_v40  ;;  %vm481_vm7 = vcmp.gt.f32.partialorder %v479_v40, 0.0 }
 0x1f0   :  { %v224_v41 = vsel %vm76_vm1, %v222_v37, -1e+30  ;;  %v223_v42 = vsel %vm75_vm2, %v221_v38, -1e+30  ;;  %v350_v43 = vsel %vm346_vm5, %v344_v30, %v348_v36  ;;  %v351_v48 = vsel %vm347_vm6, %v345_v31, %v349_v39 }
 0x1f1   :  { %v228_v44 = vsel %vm81_vm0, %v224_v41, -inf  ;;  %v225_v45 = vsel %vm81_vm0, %v223_v42, -inf  ;;  %v352_v46 = vsel %vm75_vm2, %v350_v43, -1e+30  ;;  %v353_v53 = vsel %vm76_vm1, %v351_v48, -1e+30 }
 0x1f2   :  { %229 = vmax.xlane.f32.xlu0 %v228_v44  ;;  %226 = vmax.xlane.f32.xlu1 %v225_v45  ;;  %v354_v52 = vsel %vm81_vm0, %v352_v46, -inf  ;;  %v485_v54 = vsel %vm481_vm7, %v479_v40, %v483_v49  ;;  %v484_v55 = vmul.f32 0.2, %v480_v50  ;;  %vm482_vm8 = vcmp.gt.f32.partialorder %v480_v50, 0.0 }
 0x1f3   :  { %v357_v57 = vsel %vm81_vm0, %v353_v53, -inf  ;;  %v487_v59 = vsel %vm75_vm2, %v485_v54, -1e+30  ;;  %v618_v61 = vmul.f32 0.2, %v614_v56  ;;  %vm616_vm9 = vcmp.gt.f32.partialorder %v614_v56, 0.0 }
 0x1f4   :  { %v486_v60 = vsel %vm482_vm8, %v480_v50, %v484_v55  ;;  %v489_v63 = vsel %vm81_vm0, %v487_v59, -inf  ;;  %v619_v3 = vmul.f32 0.2, %v615_v62  ;;  %vm617_vm10 = vcmp.gt.f32.partialorder %v615_v62, 0.0 }
 0x1f5   :  { %v488_v1 = vsel %vm76_vm1, %v486_v60, -1e+30  ;;  %v620_v2 = vsel %vm616_vm9, %v614_v56, %v618_v61 }
 0x1f6   :  { %355 = vmax.xlane.f32.xlu1 %v354_v52  ;;  %v492_v4 = vsel %vm81_vm0, %v488_v1, -inf  ;;  %v622_v10 = vsel %vm75_vm2, %v620_v2, -1e+30  ;;  %v621_v11 = vsel %vm617_vm10, %v615_v62, %v619_v3 }
 0x1f7   :  { %v624_v12 = vsel %vm81_vm0, %v622_v10, -inf  ;;  %v623_v13 = vsel %vm76_vm1, %v621_v11, -1e+30 }
 0x1f8   :  { %v627_v14 = vsel %vm81_vm0, %v623_v13, -inf }
 0x1fa   :  { %358 = vmax.xlane.f32.xlu1 %v357_v57 }
 0x1fe   :  { %490 = vmax.xlane.f32.xlu1 %v489_v63 }
 0x202   :  { %493 = vmax.xlane.f32.xlu1 %v492_v4 }
 0x206   :  { %625 = vmax.xlane.f32.xlu1 %v624_v12 }
 0x208   :  { %380 = vrot.lane.b32.xlu0 %v1900_v7, %s1837_s3 }
 0x20a   :  { %628 = vmax.xlane.f32.xlu1 %v627_v14 }
 0x21b   :  { %382 = vrot.lane.b32.xlu1 %v1896_v6, %s1837_s3 }
 0x21f   :  { %517 = vrot.lane.b32.xlu1 %v1896_v6, %s1838_s9 }
 0x223   :  { %652 = vrot.lane.b32.xlu1 %v1896_v6, %s1839_s10 }
 0x27b   :  { %v230_v16 = vpop.xlane.xlu0 %229  ;;  %v227_v17 = vpop.xlane.xlu1 %226 }
 0x27c   :  { %v232_v21 = vsub.f32 %v224_v41, %v230_v16  ;;  %v231_v22 = vsub.f32 %v223_v42, %v227_v17 }
 0x27e   :  { %v235_v23 = vmul.f32 1.442695, %v232_v21  ;;  %v233_v24 = vmul.f32 1.442695, %v231_v22 }
 0x27f   :  { %v356_v27 = vpop.xlane.xlu1 %355  ;;  %v381_v56 = vpop.permute.xlu0 %380 }
 0x280   :  { %1654 = vpow2.f32 %v235_v23  ;;  %v360_v28 = vsub.f32 %v352_v46, %v356_v27 }
 0x281   :  { %1656 = vpow2.f32 %v233_v24 }
 0x282   :  { %v362_v29 = vmul.f32 1.442695, %v360_v28 }
 0x283   :  { %v359_v30 = vpop.xlane.xlu1 %358 }
 0x284   :  { %v361_v31 = vsub.f32 %v353_v53, %v359_v30  ;;  %1658 = vpow2.f32 %v362_v29 }
 0x286   :  { %v364_v32 = vmul.f32 1.442695, %v361_v31 }
 0x287   :  { %v491_v33 = vpop.xlane.xlu1 %490 }
 0x288   :  { %v495_v34 = vsub.f32 %v487_v59, %v491_v33  ;;  %1660 = vpow2.f32 %v364_v32 }
 0x28a   :  { %v497_v36 = vmul.f32 1.442695, %v495_v34 }
 0x28b   :  { %v494_v6 = vpop.xlane.xlu1 %493 }
 0x28c   :  { %v496_v37 = vsub.f32 %v488_v1, %v494_v6  ;;  %1662 = vpow2.f32 %v497_v36 }
 0x28d   :  { %v1655_v38 = vpop.eup %1654 }
 0x28e   :  { %v1657_v39 = vpop.eup %1656  ;;  %v499_v40 = vmul.f32 1.442695, %v496_v37  ;;  %v1982_v45 = vsel %vm76_vm1, %v1655_v38, 0.0 }
 0x28f   :  { %v626_v41 = vpop.xlane.xlu1 %625  ;;  %v1976_v42 = vsel %vm75_vm2, %v1657_v39, 0.0  ;;  %v242_v50 = vsel %vm81_vm0, %v1982_v45, 0.0 }
 0x290   :  { %1664 = vpow2.f32 %v499_v40  ;;  %v630_v43 = vsub.f32 %v622_v10, %v626_v41  ;;  %v239_v44 = vsel %vm81_vm0, %v1976_v42, 0.0 }
 0x291   :  { %240 = vadd.xlane.f32.xlu1 %v239_v44  ;;  %v1659_v46 = vpop.eup %1658 }
 0x292   :  { %v632_v47 = vmul.f32 1.442695, %v630_v43  ;;  %v1988_v51 = vsel %vm75_vm2, %v1659_v46, 0.0 }
 0x293   :  { %v629_v48 = vpop.xlane.xlu1 %628  ;;  %v368_v55 = vsel %vm81_vm0, %v1988_v51, 0.0 }
 0x294   :  { %1666 = vpow2.f32 %v632_v47  ;;  %v631_v49 = vsub.f32 %v623_v13, %v629_v48 }
 0x295   :  { %243 = vadd.xlane.f32.xlu1 %v242_v50  ;;  %v1661_v52 = vpop.eup %1660 }
 0x296   :  { %v634_v53 = vmul.f32 1.442695, %v631_v49  ;;  %v1994_v57 = vsel %vm76_vm1, %v1661_v52, 0.0 }
 0x297   :  { %v383_v54 = vpop.permute.xlu1 %382  ;;  %v371_v60 = vsel %vm81_vm0, %v1994_v57, 0.0 }
 0x298   :  { %1668 = vpow2.f32 %v634_v53  ;;  %1562 = vmatprep.subr.mxu0 %v383_v54 }
 0x299   :  { %369 = vadd.xlane.f32.xlu1 %v368_v55  ;;  %1563 = vmatpush3.msra.mxu0 %v383_v54  ;;  %v1663_v58 = vpop.eup %1662  ;;  %v778_v54 = vld [vmem:[#allocation8 + $0x18] sm:$0xff] }
 0x29a   :  { %1564 = vmatprep.subr.mxu0 %v381_v56  ;;  %v2000_v62 = vsel %vm75_vm2, %v1663_v58, 0.0  ;;  %v777_v58 = vld [vmem:[#allocation8 + $0x10] sm:$0xff] }
 0x29b   :  { %1565 = vmatpush3.msra.mxu0 %v381_v56  ;;  %v518_v59 = vpop.permute.xlu1 %517  ;;  %v503_v3 = vsel %vm81_vm0, %v2000_v62, 0.0 }
 0x29c   :  { %1569 = vmatprep.subr.mxu1 %v518_v59 }
 0x29d   :  { %v1665_v61 = vpop.eup %1664  ;;  %372 = vadd.xlane.f32.xlu1 %v371_v60 }
 0x29e   :  { %v502_v63 = vsel %vm76_vm1, %v1665_v61, 0.0  ;;  %v775_v61 = vld [vmem:[#allocation8] sm:$0xff] }
 0x29f   :  { %v653_v1 = vpop.permute.xlu1 %652  ;;  %v506_v2 = vsel %vm81_vm0, %v502_v63, 0.0 }
 0x2a0   :  { %507 = vadd.xlane.f32.xlu0 %v506_v2  ;;  %1576 = vmatprep.subr.mxu0 %v653_v1 }
 0x2a1   :  { %v1667_v4 = vpop.eup %1666  ;;  %504 = vadd.xlane.f32.xlu1 %v503_v3 }
 0x2a2   :  { %v636_v10 = vsel %vm75_vm2, %v1667_v4, 0.0 }
 0x2a3   :  { %v638_v11 = vsel %vm81_vm0, %v636_v10, 0.0 }
 0x2a5   :  { %v1669_v12 = vpop.eup %1668  ;;  %639 = vadd.xlane.f32.xlu1 %v638_v11 }
 0x2a6   :  { %v637_v13 = vsel %vm76_vm1, %v1669_v12, 0.0 }
 0x2a7   :  { %v641_v14 = vsel %vm81_vm0, %v637_v13, 0.0 }
 0x2a8   :  { %642 = vadd.xlane.f32.xlu0 %v641_v14 }
 0x2b6   :  { %650 = vrot.lane.b32.xlu1 %v1900_v7, %s1839_s10 }
 0x2be   :  { %515 = vrot.lane.b32.xlu0 %v1900_v7, %s1838_s9 }
 0x31a   :  { %v241_v16 = vpop.xlane.xlu1 %240 }
 0x31b   :  { %v245_v17 = vmax.f32 %v241_v16, 1e-30 }
 0x31d   :  { %1670 = vrcp.f32 %v245_v17 }
 0x31e   :  { %v244_v21 = vpop.xlane.xlu1 %243 }
 0x31f   :  { %v246_v22 = vmax.f32 %v244_v21, 1e-30 }
 0x321   :  { %1672 = vrcp.f32 %v246_v22 }
 0x322   :  { %v370_v23 = vpop.xlane.xlu1 %369 }
 0x323   :  { %v374_v24 = vmax.f32 %v370_v23, 1e-30 }
 0x325   :  { %1674 = vrcp.f32 %v374_v24 }
 0x326   :  { %v373_v27 = vpop.xlane.xlu1 %372 }
 0x327   :  { %v375_v28 = vmax.f32 %v373_v27, 1e-30 }
 0x329   :  { %1676 = vrcp.f32 %v375_v28  ;;  %v508_v29 = vpop.xlane.xlu0 %507 }
 0x32a   :  { %v1671_v30 = vpop.eup %1670  ;;  %v510_v31 = vmax.f32 %v508_v29, 1e-30  ;;  %v505_v32 = vpop.xlane.xlu1 %504 }
 0x32b   :  { %v509_v33 = vmax.f32 %v505_v32, 1e-30  ;;  %v249_v34 = vmul.f32 %v1671_v30, %v1976_v42 }
 0x32c   :  { %1678 = vrcp.f32 %v510_v31 }
 0x32d   :  { %1680 = vrcp.f32 %v509_v33  ;;  %1559 = vmatprep.mubr.msk.f32.mxu1 %vm81_vm0, %v249_v34 }
 0x32e   :  { %v1673_v7 = vpop.eup %1672  ;;  %v640_v36 = vpop.xlane.xlu1 %639 }
 0x32f   :  { %v644_v6 = vmax.f32 %v640_v36, 1e-30  ;;  %v250_v37 = vmul.f32 %v1673_v7, %v1982_v45 }
 0x331   :  { %1682 = vrcp.f32 %v644_v6  ;;  %1560 = vmatmul.mubr.msk.f32.vlgmr.msra.gmra.mxu1 %vm81_vm0, %v250_v37  ;;  %v643_v38 = vpop.xlane.xlu0 %642 }
 0x332   :  { %v1675_v39 = vpop.eup %1674  ;;  %1570 = vmatpush3.msra.mxu1 %v518_v59  ;;  %v645_v40 = vmax.f32 %v643_v38, 1e-30  ;;  %v651_v47 = vpop.permute.xlu1 %650  ;;  %v776_v59 = vld [vmem:[#allocation8 + $0x8] sm:$0xff] }
 0x333   :  { %v378_v41 = vmul.f32 %v1675_v39, %v1988_v51 }
 0x334   :  { %1684 = vrcp.f32 %v645_v40 }
 0x335   :  { %1566 = vmatprep.mubr.msk.f32.mxu0 %vm81_vm0, %v378_v41  ;;  %v516_v42 = vpop.permute.xlu0 %515 }
 0x336   :  { %v1677_v43 = vpop.eup %1676  ;;  %1571 = vmatprep.subr.mxu1 %v516_v42 }
 0x337   :  { %1572 = vmatpush3.msra.mxu1 %v516_v42  ;;  %v379_v44 = vmul.f32 %v1677_v43, %v1994_v57 }
 0x338   :  { %1583 = vmatprep.subr.mxu1 %v778_v54 }
 0x339   :  { %v1679_v46 = vpop.eup %1678  ;;  %1567 = vmatmul.mubr.msk.f32.vlgmr.msra.gmra.mxu0 %vm81_vm0, %v379_v44 }
 0x33a   :  { %v1681_v45 = vpop.eup %1680  ;;  %1577 = vmatpush3.msra.mxu0 %v653_v1  ;;  %v514_v48 = vmul.f32 %v1679_v46, %v502_v63 }
 0x33b   :  { %1578 = vmatprep.subr.mxu0 %v651_v47  ;;  %v513_v49 = vmul.f32 %v1681_v45, %v2000_v62 }
 0x33c   :  { %1579 = vmatpush3.msra.mxu0 %v651_v47 }
 0x33d   :  { %1573 = vmatprep.mubr.msk.f32.mxu1 %vm81_vm0, %v513_v49 }
 0x33e   :  { %v1683_v50 = vpop.eup %1682  ;;  %1574 = vmatmul.mubr.msk.f32.vlgmr.msra.gmra.mxu1 %vm81_vm0, %v514_v48 }
 0x33f   :  { %v648_v51 = vmul.f32 %v1683_v50, %v636_v10  ;;  %1584 = vmatpush3.msra.mxu1 %v778_v54 }
 0x340   :  { %1585 = vmatprep.subr.mxu1 %v777_v58 }
 0x341   :  { %v1685_v52 = vpop.eup %1684  ;;  %1580 = vmatprep.mubr.msk.f32.mxu0 %vm81_vm0, %v648_v51  ;;  %1586 = vmatpush3.msra.mxu1 %v777_v58 }
 0x342   :  { %v649_v53 = vmul.f32 %v1685_v52, %v637_v13  ;;  %1587 = vmatprep.subr.mxu1 %v776_v59 }
 0x343   :  { %1588 = vmatpush3.msra.mxu1 %v776_v59 }
 0x344   :  { %1581 = vmatmul.mubr.msk.f32.vlgmr.msra.gmra.mxu0 %vm81_vm0, %v649_v53  ;;  %1589 = vmatprep.subr.mxu1 %v775_v61 }
 0x345   :  { %1590 = vmatpush3.msra.mxu1 %v775_v61 }
 0x3f1   :  { %v1561_v55 = vpop.f32.mrf.mxu1 }
 0x3f3   :  { %v323_v60 = vpop.f32.mrf.mxu1 }
 0x3f9   :  { %v1568_v56 = vpop.f32.mrf.mxu0 }
 0x3fa   :  { %741 = vrot.lane.b32.xlu1 %v1568_v56, %s1829_s21 }
 0x3fb   :  { %v458_v57 = vpop.f32.mrf.mxu0 }
 0x3fc   :  { %739 = vrot.lane.b32.xlu0 %v458_v57, %s1829_s21 }
 0x3fe   :  { %v1575_v62 = vpop.f32.mrf.mxu1 }
 0x3ff   :  { %749 = vrot.lane.b32.xlu1 %v1575_v62, %s1840_s11 }
 0x400   :  { %v593_v63 = vpop.f32.mrf.mxu1 }
 0x401   :  { %747 = vrot.lane.b32.xlu0 %v593_v63, %s1840_s11 }
 0x404   :  { %v1582_v1 = vpop.f32.mrf.mxu0 }
 0x405   :  { %757 = vrot.lane.b32.xlu1 %v1582_v1, %s1841_s12 }
 0x406   :  { %v728_v2 = vpop.f32.mrf.mxu0 }
 0x407   :  { %755 = vrot.lane.b32.xlu0 %v728_v2, %s1841_s12 }
 0x46c   :  { %v742_v3 = vpop.permute.xlu1 %741 }
 0x46d   :  { %v763_v12 = vsel %vm761_vm11, %v1561_v55, %v742_v3 }
 0x46e   :  { %v740_v4 = vpop.permute.xlu0 %739 }
 0x46f   :  { %v762_v16 = vsel %vm761_vm11, %v323_v60, %v740_v4 }
 0x471   :  { %v750_v10 = vpop.permute.xlu1 %749 }
 0x472   :  { %v765_v13 = vsel %vm81_vm0, %v763_v12, %v750_v10 }
 0x473   :  { %v748_v11 = vpop.permute.xlu0 %747 }
 0x474   :  { %v764_v21 = vsel %vm81_vm0, %v762_v16, %v748_v11 }
 0x477   :  { %v758_v14 = vpop.permute.xlu1 %757 }
 0x478   :  { %v768_v17 = vsel %vm766_vm12, %v765_v13, %v758_v14 }
 0x479   :  { %v756_v22 = vpop.permute.xlu0 %755  ;;  %v772_v23 = vmul.f32 0.01, %v768_v17  ;;  %vm770_vm13 = vcmp.gt.f32.partialorder %v768_v17, 0.0 }
 0x47a   :  { %v767_v24 = vsel %vm766_vm12, %v764_v21, %v756_v22 }
 0x47b   :  { %vm769_vm14 = vcmp.gt.f32.partialorder %v767_v24, 0.0  ;;  %v771_v27 = vmul.f32 0.01, %v767_v24  ;;  %v774_v29 = vsel %vm770_vm13, %v768_v17, %v772_v23 }
 0x47d   :  { %v773_v28 = vsel %vm769_vm14, %v767_v24, %v771_v27 }
 0x47e   :  { %1591 = vmatprep.mubr.msk.f32.mxu1 %vm779_vm15, %v773_v28 }
 0x47f   :  { %1592 = vmatmul.mubr.msk.f32.vlgmr.msra.gmra.mxu1 %vm779_vm15, %v774_v29 }
 0x53f   :  { %v2044_v30 = vpop.f32.mrf.mxu1 }
 0x540   :  { %865 = vrot.lane.b32.xlu1 %v2044_v30, %s1834_s2  ;;  %1594 = vmatprep.subr.mxu0 %v2044_v30 }
 0x541   :  { %v2049_v31 = vpop.f32.mrf.mxu1  ;;  %1595 = vmatpush3.msra.mxu0 %v2044_v30 }
 0x542   :  { %863 = vrot.lane.b32.xlu0 %v2049_v31, %s1834_s2  ;;  %1596 = vmatprep.subr.mxu0 %v2049_v31 }
 0x543   :  { %1597 = vmatpush3.msra.mxu0 %v2049_v31 }
 0x544   :  { %906 = vperm.xlu1 %1647, %v2044_v30  }
 0x546   :  { %1035 = vperm.xlu0 %1644, %v2044_v30  }
 0x548   :  { %1648 = vset.pattern.permute.xlu1 %v1833_v5 }
 0x549   :  { %1170 = vperm.xlu1 %1648, %v2044_v30  }
 0x54a   :  { %1649 = vset.pattern.permute.xlu0 %v1832_v0 }
 0x54b   :  { %902 = vperm.xlu0 %1649, %v2049_v31  }
 0x54d   :  { %1650 = vset.pattern.permute.xlu1 %v1835_v8 }
 0x54e   :  { %1031 = vperm.xlu1 %1650, %v2049_v31  }
 0x54f   :  { %1652 = vset.pattern.permute.xlu0 %v1836_v9 }
 0x550   :  { %1301 = vperm.xlu0 %1652, %v2049_v31  }
 0x552   :  { %1651 = vset.pattern.permute.xlu1 %v1833_v5 }
 0x553   :  { %1166 = vperm.xlu1 %1651, %v2049_v31  }
 0x557   :  { %1653 = vset.pattern.permute.xlu1 %v1836_v9 }
 0x558   :  { %1305 = vperm.xlu1 %1653, %v2044_v30  }
 0x5b2   :  { %v866_v0 = vpop.permute.xlu1 %865 }
 0x5b4   :  { %v864_v32 = vpop.permute.xlu0 %863 }
 0x5b5   :  { %869 = vxpose.xlu1.b32.start [1/2] (short) (narrow) %v864_v32, 8 }
 0x5b9   :  { %870 = vxpose.xlu1.b32.end [2/2] (short) (narrow) %v866_v0, 8 }
 0x5bf   :  { %v907_v33 = vpop.permute.xlu1 %906 }
 0x5c1   :  { %v1036_v36 = vpop.permute.xlu0 %1035 }
 0x5c4   :  { %v1171_v8 = vpop.permute.xlu1 %1170 }
 0x5c6   :  { %v903_v39 = vpop.permute.xlu0 %902 }
 0x5c9   :  { %v1032_v34 = vpop.permute.xlu1 %1031 }
 0x5cb   :  { %v1302_v59 = vpop.permute.xlu0 %1301 }
 0x5ce   :  { %v1167_v7 = vpop.permute.xlu1 %1166 }
 0x5d3   :  { %v1306_v6 = vpop.permute.xlu1 %1305 }
 0x631   :  { %v885_v37 = vpop.trf.xlu1 }
 0x632   :  { %v912_v5 = vrot.slane %v885_v37, %v213_v18  ;;  %v1041_v38 = vrot.slane %v885_v37, %v342_v19  ;;  %v1176_v9 = vrot.slane %v885_v37, %v477_v20  ;;  %v1311_v54 = vrot.slane %v885_v37, %v612_v35 }
 0x634   :  { %v1177_v40 = vadd.f32 %v1176_v9, %v1167_v7  ;;  %v913_v41 = vadd.f32 %v912_v5, %v903_v39  ;;  %v914_v42 = vadd.f32 %v912_v5, %v907_v33  ;;  %v1042_v43 = vadd.f32 %v1041_v38, %v1032_v34 }
 0x635   :  { %v1043_v49 = vadd.f32 %v1041_v38, %v1036_v36  ;;  %v1178_v57 = vadd.f32 %v1176_v9, %v1171_v8  ;;  %v1312_v63 = vadd.f32 %v1311_v54, %v1302_v59  ;;  %v1313_v3 = vadd.f32 %v1311_v54, %v1306_v6 }
 0x636   :  { %vm1179_vm3 = vcmp.gt.f32.partialorder %v1177_v40, 0.0  ;;  %v1181_v44 = vmul.f32 0.2, %v1177_v40  ;;  %vm915_vm4 = vcmp.gt.f32.partialorder %v913_v41, 0.0  ;;  %v917_v46 = vmul.f32 0.2, %v913_v41 }
 0x637   :  { %vm916_vm5 = vcmp.gt.f32.partialorder %v914_v42, 0.0  ;;  %v918_v45 = vmul.f32 0.2, %v914_v42  ;;  %v1046_v18 = vmul.f32 0.2, %v1042_v43  ;;  %vm1044_vm6 = vcmp.gt.f32.partialorder %v1042_v43, 0.0 }
 0x638   :  { %v1183_v47 = vsel %vm1179_vm3, %v1177_v40, %v1181_v44  ;;  %v919_v48 = vsel %vm915_vm4, %v913_v41, %v917_v46  ;;  %v1047_v56 = vmul.f32 0.2, %v1043_v49  ;;  %vm1045_vm7 = vcmp.gt.f32.partialorder %v1043_v49, 0.0 }
 0x639   :  { %v2078_v19 = vsel %vm75_vm2, %v1183_v47, -1e+30  ;;  %v921_v20 = vsel %vm75_vm2, %v919_v48, -1e+30  ;;  %v920_v50 = vsel %vm916_vm5, %v914_v42, %v918_v45  ;;  %v1048_v55 = vsel %vm1044_vm6, %v1042_v43, %v1046_v18 }
 0x63a   :  { %v1187_v51 = vsel %vm81_vm0, %v2078_v19, -inf  ;;  %v923_v52 = vsel %vm81_vm0, %v921_v20, -inf  ;;  %v922_v53 = vsel %vm76_vm1, %v920_v50, -1e+30  ;;  %v1050_v60 = vsel %vm75_vm2, %v1048_v55, -1e+30 }
 0x63b   :  { %1188 = vmax.xlane.f32.xlu1 %v1187_v51  ;;  %924 = vmax.xlane.f32.xlu0 %v923_v52  ;;  %v926_v58 = vsel %vm81_vm0, %v922_v53, -inf  ;;  %v1049_v61 = vsel %vm1045_vm7, %v1043_v49, %v1047_v56  ;;  %v1182_v62 = vmul.f32 0.2, %v1178_v57  ;;  %vm1180_vm8 = vcmp.gt.f32.partialorder %v1178_v57, 0.0 }
 0x63c   :  { %v1052_v1 = vsel %vm81_vm0, %v1050_v60, -inf  ;;  %v1051_v15 = vsel %vm76_vm1, %v1049_v61, -1e+30  ;;  %v1316_v2 = vmul.f32 0.2, %v1312_v63  ;;  %vm1314_vm9 = vcmp.gt.f32.partialorder %v1312_v63, 0.0 }
 0x63d   :  { %v1184_v35 = vsel %vm1180_vm8, %v1178_v57, %v1182_v62  ;;  %v1055_v4 = vsel %vm81_vm0, %v1051_v15, -inf  ;;  %v1317_v12 = vmul.f32 0.2, %v1313_v3  ;;  %vm1315_vm10 = vcmp.gt.f32.partialorder %v1313_v3, 0.0 }
 0x63e   :  { %v1186_v10 = vsel %vm76_vm1, %v1184_v35, -1e+30  ;;  %v1318_v11 = vsel %vm1314_vm9, %v1312_v63, %v1316_v2 }
 0x63f   :  { %927 = vmax.xlane.f32.xlu0 %v926_v58  ;;  %v1190_v13 = vsel %vm81_vm0, %v1186_v10, -inf  ;;  %v1320_v14 = vsel %vm75_vm2, %v1318_v11, -1e+30  ;;  %v1319_v16 = vsel %vm1315_vm10, %v1313_v3, %v1317_v12 }
 0x640   :  { %v1322_v17 = vsel %vm81_vm0, %v1320_v14, -inf  ;;  %v1321_v21 = vsel %vm76_vm1, %v1319_v16, -1e+30 }
 0x641   :  { %v1325_v22 = vsel %vm81_vm0, %v1321_v21, -inf }
 0x643   :  { %1053 = vmax.xlane.f32.xlu0 %v1052_v1 }
 0x647   :  { %1056 = vmax.xlane.f32.xlu0 %v1055_v4 }
 0x64b   :  { %1191 = vmax.xlane.f32.xlu0 %v1190_v13 }
 0x64c   :  { %1078 = vrot.lane.b32.xlu1 %v2049_v31, %s1837_s3 }
 0x64f   :  { %1323 = vmax.xlane.f32.xlu0 %v1322_v17 }
 0x650   :  { %1215 = vrot.lane.b32.xlu1 %v2044_v30, %s1838_s9 }
 0x653   :  { %1326 = vmax.xlane.f32.xlu0 %v1325_v22 }
 0x669   :  { %1080 = vrot.lane.b32.xlu0 %v2044_v30, %s1837_s3 }
 0x66d   :  { %1350 = vrot.lane.b32.xlu0 %v2044_v30, %s1839_s10 }
 0x6c4   :  { %v1189_v23 = vpop.xlane.xlu1 %1188  ;;  %v925_v24 = vpop.xlane.xlu0 %924 }
 0x6c5   :  { %v929_v27 = vsub.f32 %v921_v20, %v925_v24  ;;  %v1193_v36 = vsub.f32 %v2078_v19, %v1189_v23 }
 0x6c7   :  { %v931_v28 = vmul.f32 1.442695, %v929_v27  ;;  %v1195_v5 = vmul.f32 1.442695, %v1193_v36 }
 0x6c8   :  { %v2113_v29 = vpop.permute.xlu1 %1078  ;;  %v928_v32 = vpop.xlane.xlu0 %927 }
 0x6c9   :  { %v930_v0 = vsub.f32 %v922_v53, %v928_v32  ;;  %1686 = vpow2.f32 %v931_v28 }
 0x6cb   :  { %v933_v33 = vmul.f32 1.442695, %v930_v0 }
 0x6cc   :  { %v1216_v8 = vpop.permute.xlu1 %1215  ;;  %v1054_v34 = vpop.xlane.xlu0 %1053 }
 0x6cd   :  { %1688 = vpow2.f32 %v933_v33  ;;  %v1058_v7 = vsub.f32 %v1050_v60, %v1054_v34  ;;  %1608 = vmatprep.subr.mxu1 %v1216_v8 }
 0x6ce   :  { %1609 = vmatpush3.msra.mxu1 %v1216_v8 }
 0x6cf   :  { %v1060_v6 = vmul.f32 1.442695, %v1058_v7 }
 0x6d0   :  { %v1057_v30 = vpop.xlane.xlu0 %1056 }
 0x6d1   :  { %1690 = vpow2.f32 %v1060_v6  ;;  %v1059_v37 = vsub.f32 %v1051_v15, %v1057_v30 }
 0x6d3   :  { %v1062_v38 = vmul.f32 1.442695, %v1059_v37 }
 0x6d4   :  { %v1192_v9 = vpop.xlane.xlu0 %1191 }
 0x6d5   :  { %1692 = vpow2.f32 %v1062_v38  ;;  %v1194_v39 = vsub.f32 %v1186_v10, %v1192_v9 }
 0x6d6   :  { %1694 = vpow2.f32 %v1195_v5  ;;  %v1687_v40 = vpop.eup %1686 }
 0x6d7   :  { %v1197_v41 = vmul.f32 1.442695, %v1194_v39  ;;  %v935_v43 = vsel %vm75_vm2, %v1687_v40, 0.0 }
 0x6d8   :  { %v1324_v42 = vpop.xlane.xlu0 %1323  ;;  %v937_v46 = vsel %vm81_vm0, %v935_v43, 0.0 }
 0x6d9   :  { %v1328_v44 = vsub.f32 %v1320_v14, %v1324_v42  ;;  %1696 = vpow2.f32 %v1197_v41  ;;  %938 = vadd.xlane.f32.xlu0 %v937_v46 }
 0x6da   :  { %v1689_v45 = vpop.eup %1688 }
 0x6db   :  { %v1330_v47 = vmul.f32 1.442695, %v1328_v44  ;;  %v936_v48 = vsel %vm76_vm1, %v1689_v45, 0.0 }
 0x6dc   :  { %v1327_v18 = vpop.xlane.xlu0 %1326  ;;  %v940_v49 = vsel %vm81_vm0, %v936_v48, 0.0 }
 0x6dd   :  { %v1329_v19 = vsub.f32 %v1321_v21, %v1327_v18  ;;  %1698 = vpow2.f32 %v1330_v47  ;;  %941 = vadd.xlane.f32.xlu0 %v940_v49 }
 0x6de   :  { %v1691_v20 = vpop.eup %1690 }
 0x6df   :  { %v1332_v50 = vmul.f32 1.442695, %v1329_v19  ;;  %v1064_v51 = vsel %vm75_vm2, %v1691_v20, 0.0 }
 0x6e0   :  { %v1081_v52 = vpop.permute.xlu0 %1080  ;;  %v1066_v53 = vsel %vm81_vm0, %v1064_v51, 0.0 }
 0x6e1   :  { %1700 = vpow2.f32 %v1332_v50  ;;  %1601 = vmatprep.subr.mxu0 %v1081_v52  ;;  %1067 = vadd.xlane.f32.xlu0 %v1066_v53 }
 0x6e2   :  { %v1693_v54 = vpop.eup %1692 }
 0x6e3   :  { %v1695_v55 = vpop.eup %1694  ;;  %v1065_v56 = vsel %vm76_vm1, %v1693_v54, 0.0 }
 0x6e4   :  { %v1069_v57 = vsel %vm81_vm0, %v1065_v56, 0.0  ;;  %v2130_v58 = vsel %vm75_vm2, %v1695_v55, 0.0  ;;  %v1351_v26 = vpop.permute.xlu0 %1350 }
 0x6e5   :  { %1070 = vadd.xlane.f32.xlu0 %v1069_v57  ;;  %v1201_v60 = vsel %vm81_vm0, %v2130_v58, 0.0 }
 0x6e6   :  { %v1697_v59 = vpop.eup %1696 }
 0x6e7   :  { %v2136_v61 = vsel %vm76_vm1, %v1697_v59, 0.0 }
 0x6e8   :  { %v1204_v63 = vsel %vm81_vm0, %v2136_v61, 0.0 }
 0x6e9   :  { %1202 = vadd.xlane.f32.xlu0 %v1201_v60 }
 0x6ea   :  { %v1699_v62 = vpop.eup %1698 }
 0x6eb   :  { %v2142_v15 = vsel %vm75_vm2, %v1699_v62, 0.0 }
 0x6ec   :  { %v1336_v3 = vsel %vm81_vm0, %v2142_v15, 0.0 }
 0x6ed   :  { %1205 = vadd.xlane.f32.xlu0 %v1204_v63 }
 0x6ee   :  { %v1701_v1 = vpop.eup %1700 }
 0x6ef   :  { %v2146_v35 = vsel %vm76_vm1, %v1701_v1, 0.0 }
 0x6f0   :  { %v1339_v2 = vsel %vm81_vm0, %v2146_v35, 0.0 }
 0x6f1   :  { %1340 = vadd.xlane.f32.xlu1 %v1339_v2  ;;  %1337 = vadd.xlane.f32.xlu0 %v1336_v3 }
 0x702   :  { %1213 = vrot.lane.b32.xlu1 %v2049_v31, %s1838_s9 }
 0x707   :  { %1348 = vrot.lane.b32.xlu0 %v2049_v31, %s1839_s10 }
 0x762   :  { %v939_v4 = vpop.xlane.xlu0 %938 }
 0x763   :  { %v943_v10 = vmax.f32 %v939_v4, 1e-30 }
 0x765   :  { %1702 = vrcp.f32 %v943_v10 }
 0x766   :  { %v942_v25 = vpop.xlane.xlu0 %941 }
 0x767   :  { %v944_v11 = vmax.f32 %v942_v25, 1e-30 }
 0x769   :  { %1704 = vrcp.f32 %v944_v11 }
 0x76a   :  { %v1068_v12 = vpop.xlane.xlu0 %1067 }
 0x76b   :  { %v1072_v13 = vmax.f32 %v1068_v12, 1e-30 }
 0x76d   :  { %1706 = vrcp.f32 %v1072_v13 }
 0x76e   :  { %v1071_v14 = vpop.xlane.xlu0 %1070 }
 0x76f   :  { %v1073_v16 = vmax.f32 %v1071_v14, 1e-30 }
 0x771   :  { %1708 = vrcp.f32 %v1073_v16 }
 0x772   :  { %v1703_v17 = vpop.eup %1702  ;;  %v1203_v21 = vpop.xlane.xlu0 %1202 }
 0x773   :  { %v1207_v22 = vmax.f32 %v1203_v21, 1e-30  ;;  %v947_v23 = vmul.f32 %v1703_v17, %v935_v43 }
 0x775   :  { %1710 = vrcp.f32 %v1207_v22  ;;  %1598 = vmatprep.mubr.msk.f32.mxu0 %vm81_vm0, %v947_v23 }
 0x776   :  { %v1705_v31 = vpop.eup %1704  ;;  %v1206_v24 = vpop.xlane.xlu0 %1205 }
 0x777   :  { %v1208_v27 = vmax.f32 %v1206_v24, 1e-30  ;;  %v948_v28 = vmul.f32 %v1705_v31, %v936_v48 }
 0x779   :  { %1712 = vrcp.f32 %v1208_v27  ;;  %1599 = vmatmul.mubr.msk.f32.vlgmr.msra.gmra.mxu0 %vm81_vm0, %v948_v28 }
 0x77a   :  { %v1341_v32 = vpop.xlane.xlu1 %1340  ;;  %v1707_v0 = vpop.eup %1706  ;;  %1602 = vmatpush3.msra.mxu0 %v1081_v52 }
 0x77b   :  { %v1343_v33 = vmax.f32 %v1341_v32, 1e-30  ;;  %v1338_v8 = vpop.xlane.xlu0 %1337  ;;  %1603 = vmatprep.subr.mxu0 %v2113_v29  ;;  %v1076_v7 = vmul.f32 %v1707_v0, %v1064_v51 }
 0x77c   :  { %v1342_v34 = vmax.f32 %v1338_v8, 1e-30  ;;  %1604 = vmatpush3.msra.mxu0 %v2113_v29 }
 0x77d   :  { %1714 = vrcp.f32 %v1343_v33  ;;  %1615 = vmatprep.subr.mxu0 %v1351_v26  ;;  %1605 = vmatprep.mubr.msk.f32.mxu0 %vm81_vm0, %v1076_v7 }
 0x77e   :  { %1716 = vrcp.f32 %v1342_v34  ;;  %v1214_v36 = vpop.permute.xlu1 %1213  ;;  %v1709_v6 = vpop.eup %1708 }
 0x77f   :  { %1610 = vmatprep.subr.mxu1 %v1214_v36  ;;  %v1077_v30 = vmul.f32 %v1709_v6, %v1065_v56  ;;  %v1349_v5 = vpop.permute.xlu0 %1348 }
 0x780   :  { %1611 = vmatpush3.msra.mxu1 %v1214_v36 }
 0x781   :  { %1606 = vmatmul.mubr.msk.f32.vlgmr.msra.gmra.mxu0 %vm81_vm0, %v1077_v30 }
 0x782   :  { %v1711_v37 = vpop.eup %1710  ;;  %1616 = vmatpush3.msra.mxu0 %v1351_v26 }
 0x783   :  { %1617 = vmatprep.subr.mxu0 %v1349_v5  ;;  %v1211_v38 = vmul.f32 %v1711_v37, %v2130_v58 }
 0x784   :  { %1618 = vmatpush3.msra.mxu0 %v1349_v5 }
 0x785   :  { %1612 = vmatprep.mubr.msk.f32.mxu1 %vm81_vm0, %v1211_v38 }
 0x786   :  { %v1713_v29 = vpop.eup %1712 }
 0x787   :  { %v1212_v9 = vmul.f32 %v1713_v29, %v2136_v61 }
 0x789   :  { %1613 = vmatmul.mubr.msk.f32.vlgmr.msra.gmra.mxu1 %vm81_vm0, %v1212_v9 }
 0x78a   :  { %v1715_v39 = vpop.eup %1714 }
 0x78b   :  { %v1717_v40 = vpop.eup %1716  ;;  %v1347_v41 = vmul.f32 %v1715_v39, %v2146_v35 }
 0x78c   :  { %v1346_v42 = vmul.f32 %v1717_v40, %v2142_v15 }
 0x78e   :  { %1619 = vmatprep.mubr.msk.f32.mxu0 %vm81_vm0, %v1346_v42 }
 0x78f   :  { %1620 = vmatmul.mubr.msk.f32.vlgmr.msra.gmra.mxu0 %vm81_vm0, %v1347_v41 }
 0x839   :  { %v1600_v43 = vpop.f32.mrf.mxu0 }
 0x83b   :  { %v1021_v44 = vpop.f32.mrf.mxu0 }
 0x841   :  { %v1607_v46 = vpop.f32.mrf.mxu0 }
 0x843   :  { %v1156_v48 = vpop.f32.mrf.mxu0 }
 0x849   :  { %v1614_v45 = vpop.f32.mrf.mxu1 }
 0x84a   :  { %1447 = vrot.lane.b32.xlu0 %v1614_v45, %s1840_s11 }
 0x84b   :  { %v1291_v47 = vpop.f32.mrf.mxu1 }
 0x84c   :  { %1445 = vrot.lane.b32.xlu1 %v1291_v47, %s1840_s11 }
 0x84e   :  { %1439 = vrot.lane.b32.xlu0 %v1607_v46, %s1829_s21 }
 0x84f   :  { %v1621_v18 = vpop.f32.mrf.mxu0 }
 0x850   :  { %1437 = vrot.lane.b32.xlu1 %v1156_v48, %s1829_s21 }
 0x851   :  { %v1426_v49 = vpop.f32.mrf.mxu0 }
 0x852   :  { %1455 = vrot.lane.b32.xlu0 %v1621_v18, %s1841_s12 }
 0x854   :  { %1453 = vrot.lane.b32.xlu1 %v1426_v49, %s1841_s12 }
 0x8bc   :  { %v1448_v19 = vpop.permute.xlu0 %1447 }
 0x8be   :  { %v1446_v20 = vpop.permute.xlu1 %1445 }
 0x8c0   :  { %v1440_v50 = vpop.permute.xlu0 %1439 }
 0x8c1   :  { %v1460_v51 = vsel %vm761_vm11, %v1600_v43, %v1440_v50 }
 0x8c2   :  { %v1438_v52 = vpop.permute.xlu1 %1437  ;;  %v1462_v54 = vsel %vm81_vm0, %v1460_v51, %v1448_v19 }
 0x8c3   :  { %v1459_v53 = vsel %vm761_vm11, %v1021_v44, %v1438_v52 }
 0x8c4   :  { %v1456_v55 = vpop.permute.xlu0 %1455  ;;  %v1461_v57 = vsel %vm81_vm0, %v1459_v53, %v1446_v20 }
 0x8c5   :  { %v1464_v56 = vsel %vm766_vm12, %v1462_v54, %v1456_v55 }
 0x8c6   :  { %1466 = vst.msk [vmem:[#allocation10 + $0x8] sm:$0xff] %vm779_vm15, %v1464_v56  ;;  %v1454_v58 = vpop.permute.xlu1 %1453 }
 0x8c7   :  { %v1463_v59 = vsel %vm766_vm12, %v1461_v57, %v1454_v58 }
 0x8c8   :  { %1465 = vst.msk [vmem:[#allocation10] sm:$0xff] %vm779_vm15, %v1463_v59 }
 0x8c9   :  { %1809 = shalt.err (!%p1806_p10)
}
 0x8ca   :  { %1478 = dma.vmem_to_hbm [thread:$0]  %s1473_s14, 256, %s2194_s4, [#allocation4], %s1828_s20, %s1828_s20, %s1829_s21  }
 0x8cb   :  { %1824 = dma.done.wait [#allocation4], 256  }
 0x8cc   :  { %1825 = vsyncadd [#allocation4], 4294967040 }
 0x8cd   :  { %1482 = vsyncpa [#allocation3], 1 }
 0x8ce   :  { %1483 = vsyncpa [#allocation6], 1 }
 0x8cf   :  { %1484 = vsyncpa [#allocation9], 1 }
 0x8d0   :  { %1485 = vsyncpa [#allocation4], 1 }

</bundles_post_ra>
